<compile_context>
chip_gen: v5e
topology: v5e:2x2
jax: 0.10.0
libtpu: 0.0.40
codegen_flags: <defaults>
</compile_context>

<pallas_src>
import math
import jax
import jax.numpy as jnp
from jax import lax
from jax.experimental import pallas as pl
from jax.experimental.pallas import tpu as pltpu  # noqa: F401

# ---- model hyper-parameters (small, consistent with the module) ----
B = 2          # batch
S = 8          # sequence length
D = 32         # d_model (= layer.size)
FF = 64        # feed-forward hidden dim
H = 4          # attention heads
DK = D // H    # per-head dim
N_LAYERS = 2   # Encoder N
EPS = 1e-6
BS = B * S

# ---- packed operand layouts ----
W_ROWS = 3 * D + FF        # 160 rows / layer: [wqkv(32) ; wo(32) ; w1(32) ; w2(64)]
VW = 3 * D                 # 96-lane width of the f32 vector/bias slab
VROWS = 8                  # per-layer rows: [ln1_a, ln1_b, ln2_a, ln2_b, bo, b2, b1, bqkv]


# ------------------------- fused Pallas kernel -------------------------

def _ln(y, a, b):
    """Torch-style LayerNorm: unbiased std, divide by (std + eps). a, b: (1, D)."""
    mean = jnp.mean(y, axis=-1, keepdims=True)
    var = jnp.sum((y - mean) ** 2, axis=-1, keepdims=True) * (1.0 / (y.shape[-1] - 1))
    std = jnp.sqrt(var)
    inv = pl.reciprocal(std + EPS, approx=True)
    return a * (y - mean) * inv + b


def encoder_kernel(x_ref, amask_ref, w_ref, vecs_ref, o_ref):
    # x_ref:     (B*S, D)            f32 activation slab
    # amask_ref: (B*H*S, S)          f32 additive mask (0 / -1e9), row order (b, h, q)
    # w_ref:     (N_LAYERS, 160, 96) bf16 weight slab, rows per layer:
    #            [0:32]   wqkv  (D, 3D)  (1/sqrt(DK) folded into the Wq columns)
    #            [32:64]  wo    (D, D)   in lanes 0:D
    #            [64:96]  w1    (D, FF)  in lanes 0:FF
    #            [96:160] w2    (FF, D)  in lanes 0:D
    # vecs_ref:  (2*8+2, 96)         f32 rows per layer:
    #            [ln1_a, ln1_b, ln2_a, ln2_b, bo, b2, b1, bqkv]; final [norm_a, norm_b]
    x = x_ref[...].astype(jnp.float32)
    am = amask_ref[...]

    for l in range(N_LAYERS):                       # unrolled: N_LAYERS = 2
        v0 = l * VROWS
        ln1_a = vecs_ref[v0 + 0:v0 + 1, 0:D]
        ln1_b = vecs_ref[v0 + 1:v0 + 2, 0:D]
        ln2_a = vecs_ref[v0 + 2:v0 + 3, 0:D]
        ln2_b = vecs_ref[v0 + 3:v0 + 4, 0:D]
        bo    = vecs_ref[v0 + 4:v0 + 5, 0:D]
        b2    = vecs_ref[v0 + 5:v0 + 6, 0:D]
        b1    = vecs_ref[v0 + 6:v0 + 7, 0:FF]
        bqkv  = vecs_ref[v0 + 7:v0 + 8, :]          # (1, 3D), scale folded into bq part

        wqkv = w_ref[l, 0:D, :]                     # (D, 3D) bf16
        wo   = w_ref[l, D:2 * D, 0:D]               # (D, D)
        w1   = w_ref[l, 2 * D:3 * D, 0:FF]          # (D, FF)
        w2   = w_ref[l, 3 * D:3 * D + FF, 0:D]      # (FF, D)

        # ---- sublayer 1: x + SelfAttn(LN(x))  (dropout == identity) ----
        xn = _ln(x, ln1_a, ln1_b)
        qkv = jnp.dot(xn.astype(jnp.bfloat16), wqkv,
                      preferred_element_type=jnp.float32) + bqkv      # (BS, 3D)

        # scores for every (batch, head) tile, stacked along sublanes
        tiles = []
        for b in range(B):
            r0 = b * S
            for h in range(H):
                q = qkv[r0:r0 + S, h * DK:(h + 1) * DK].astype(jnp.bfloat16)
                k = qkv[r0:r0 + S, D + h * DK:D + (h + 1) * DK].astype(jnp.bfloat16)
                tiles.append(lax.dot_general(
                    q, k, (((1,), (1,)), ((), ())),
                    preferred_element_type=jnp.float32))              # (S, S)
        scores = jnp.concatenate(tiles, axis=0) + am                  # (B*H*S, S)

        # single batched softmax for all B*H tiles
        smax = jnp.max(scores, axis=-1, keepdims=True)
        e = jnp.exp(scores - smax)
        p = e * pl.reciprocal(jnp.sum(e, axis=-1, keepdims=True), approx=True)

        # per-head contexts, lane-packed back into a (BS, D) slab
        ctx_rows = []
        for b in range(B):
            r0 = b * S
            heads = []
            for h in range(H):
                t0 = (b * H + h) * S
                pt = p[t0:t0 + S, :].astype(jnp.bfloat16)              # (S, S)
                v = qkv[r0:r0 + S,
                        2 * D + h * DK:2 * D + (h + 1) * DK].astype(jnp.bfloat16)
                heads.append(jnp.dot(pt, v,
                                     preferred_element_type=jnp.float32))  # (S, DK)
            ctx_rows.append(jnp.concatenate(heads, axis=1))           # (S, D)
        ctx = jnp.concatenate(ctx_rows, axis=0)                       # (BS, D)

        attn = jnp.dot(ctx.astype(jnp.bfloat16), wo,
                       preferred_element_type=jnp.float32) + bo       # one 32x32 proj
        x = x + attn

        # ---- sublayer 2: x + FFN(LN(x)) ----
        xn2 = _ln(x, ln2_a, ln2_b)
        h1 = jnp.maximum(jnp.dot(xn2.astype(jnp.bfloat16), w1,
                                 preferred_element_type=jnp.float32) + b1, 0.0)
        ff = jnp.dot(h1.astype(jnp.bfloat16), w2,
                     preferred_element_type=jnp.float32) + b2
        x = x + ff

    # ---- final LayerNorm ----
    nb = N_LAYERS * VROWS
    norm_a = vecs_ref[nb + 0:nb + 1, 0:D]
    norm_b = vecs_ref[nb + 1:nb + 2, 0:D]
    o_ref[...] = _ln(x, norm_a, norm_b).astype(o_ref.dtype)


# ------------------------- parameter packing (once, at load time) -------------------------

def _row(v, width=VW):
    v = jnp.asarray(v, jnp.float32).reshape(1, -1)
    return jnp.pad(v, ((0, 0), (0, width - v.shape[1])))


def pack_params(params):
    """One-time packing into two lane-dense slabs (bf16 weights, f32 vectors/biases).
    Called ONCE outside the jitted forward path."""
    scale = 1.0 / math.sqrt(DK)
    w_layers, vec_rows = [], []
    for lp in params["layers"]:
        wqkv = jnp.concatenate([lp["wq"] * scale, lp["wk"], lp["wv"]], axis=1)  # (D, 3D)
        bqkv = jnp.concatenate([lp["bq"] * scale, lp["bk"], lp["bv"]], axis=1)  # (1, 3D)
        wl = jnp.zeros((W_ROWS, 3 * D), jnp.float32)
        wl = wl.at[0:D, :].set(wqkv)
        wl = wl.at[D:2 * D, 0:D].set(lp["wo"])
        wl = wl.at[2 * D:3 * D, 0:FF].set(lp["w1"])
        wl = wl.at[3 * D:3 * D + FF, 0:D].set(lp["w2"])
        w_layers.append(wl)
        vec_rows += [_row(lp["ln1_a"]), _row(lp["ln1_b"]),
                     _row(lp["ln2_a"]), _row(lp["ln2_b"]),
                     _row(lp["bo"]), _row(lp["b2"]),
                     _row(lp["b1"]), _row(bqkv)]
    vec_rows += [_row(params["norm_a"]), _row(params["norm_b"])]
    return dict(
        w=jnp.stack(w_layers, axis=0).astype(jnp.bfloat16),   # (N_LAYERS, 160, 96) bf16
        vecs=jnp.concatenate(vec_rows, axis=0),                # (2*8+2, 96) f32
    )


# ------------------------- forward wrapper -------------------------

@jax.jit
def encoder_forward(x, mask, w, vecs):
    """Encoder.forward: x -> layer_1 -> ... -> layer_N -> LayerNorm (one kernel)."""
    # additive mask (0 / -1e9), replicated per head / query row -> (B*H*S, S)
    am = jnp.where(mask == 0.0, jnp.float32(-1e9), jnp.float32(0.0))        # (B, 1, S)
    am_slab = jnp.broadcast_to(am[:, :, None, :], (B, H, S, S)).reshape(B * H * S, S)
    # No grid: a single invocation processes the whole problem; all operands are
    # whole-array VMEM blocks (default BlockSpecs).  VMEM footprint < 0.3 MiB on
    # v5e/v6e (128 MiB) and v7x (64 MiB).
    out = pl.pallas_call(
        encoder_kernel,
        out_shape=jax.ShapeDtypeStruct((BS, D), x.dtype),
    )(x.reshape(BS, D), am_slab, w, vecs)
    return out.reshape(B, S, D)


# ------------------------- pure-JAX reference -------------------------

def _ref_layer_norm(y, a, b):
    mean = jnp.mean(y, axis=-1, keepdims=True)
    var = jnp.sum((y - mean) ** 2, axis=-1, keepdims=True) / (y.shape[-1] - 1)
    std = jnp.sqrt(var)
    return a * (y - mean) / (std + EPS) + b


def ref_encoder(x, mask, params):
    Bx, Sx, Dx = x.shape
    for lp in params["layers"]:
        xn = _ref_layer_norm(x, lp["ln1_a"][0], lp["ln1_b"][0])
        q = xn @ lp["wq"] + lp["bq"][0]
        k = xn @ lp["wk"] + lp["bk"][0]
        v = xn @ lp["wv"] + lp["bv"][0]

        def split(t):
            return t.reshape(Bx, Sx, H, DK).transpose(0, 2, 1, 3)   # (B,H,S,DK)

        qh, kh, vh = split(q), split(k), split(v)
        scores = jnp.einsum("bhqd,bhkd->bhqk", qh, kh) / math.sqrt(DK)
        scores = jnp.where(mask[:, None, :, :] == 0.0, -1e9, scores)
        p = jax.nn.softmax(scores, axis=-1)
        att = jnp.einsum("bhqk,bhkd->bhqd", p, vh).transpose(0, 2, 1, 3).reshape(Bx, Sx, Dx)
        x = x + att @ lp["wo"] + lp["bo"][0]

        xn = _ref_layer_norm(x, lp["ln2_a"][0], lp["ln2_b"][0])
        x = x + jnp.maximum(xn @ lp["w1"] + lp["b1"][0], 0.0) @ lp["w2"] + lp["b2"][0]
    return _ref_layer_norm(x, params["norm_a"][0], params["norm_b"][0])


# ------------------------- deterministic params -------------------------

def init_params(key):
    params = {"layers": []}
    for _ in range(N_LAYERS):
        key, *ks = jax.random.split(key, 13)
        lp = {
            "ln1_a": jnp.ones((1, D), jnp.float32),
            "ln1_b": jnp.zeros((1, D), jnp.float32),
            "wq": 0.1 * jax.random.normal(ks[0], (D, D), jnp.float32),
            "bq": 0.1 * jax.random.normal(ks[1], (1, D), jnp.float32),
            "wk": 0.1 * jax.random.normal(ks[2], (D, D), jnp.float32),
            "bk": 0.1 * jax.random.normal(ks[3], (1, D), jnp.float32),
            "wv": 0.1 * jax.random.normal(ks[4], (D, D), jnp.float32),
            "bv": 0.1 * jax.random.normal(ks[5], (1, D), jnp.float32),
            "wo": 0.1 * jax.random.normal(ks[6], (D, D), jnp.float32),
            "bo": 0.1 * jax.random.normal(ks[7], (1, D), jnp.float32),
            "ln2_a": jnp.ones((1, D), jnp.float32),
            "ln2_b": jnp.zeros((1, D), jnp.float32),
            "w1": 0.1 * jax.random.normal(ks[8], (D, FF), jnp.float32),
            "b1": 0.1 * jax.random.normal(ks[9], (1, FF), jnp.float32),
            "w2": 0.1 * jax.random.normal(ks[10], (FF, D), jnp.float32),
            "b2": 0.1 * jax.random.normal(ks[11], (1, D), jnp.float32),
        }
        params["layers"].append(lp)
    params["norm_a"] = jnp.ones((1, D), jnp.float32)
    params["norm_b"] = jnp.zeros((1, D), jnp.float32)
    return params


if __name__ == "__main__":
    key = jax.random.PRNGKey(0)
    key, kx = jax.random.split(key)
    x = jax.random.normal(kx, (B, S, D), jnp.float32)
    # key-padding mask: last 2 positions masked (semantics of masked_fill(mask==0, -1e9))
    mask = jnp.ones((B, 1, S), jnp.float32).at[:, :, S - 2:].set(0.0)

    params = init_params(key)
    packed = pack_params(params)     # one-time packing, outside the per-call jit path

    out = jax.block_until_ready(encoder_forward(x, mask, packed["w"], packed["vecs"]))
    ref = jax.block_until_ready(ref_encoder(x, mask, params))

    assert out.shape == (B, S, D)
    assert bool(jnp.all(jnp.isfinite(out)))
    err = float(jnp.max(jnp.abs(out - ref)))
    assert jnp.allclose(out, ref, rtol=2e-2, atol=2e-2), err

    print("KERNEL_OK")
</pallas_src>

<mosaic_0001>
module attributes {stable_mosaic.version = 11 : i64} {
  func.func @encoder_kernel(%arg0: memref<16x32xf32, #tpu.memory_space<vmem>>, %arg1: memref<64x8xf32, #tpu.memory_space<vmem>>, %arg2: memref<2x160x96xbf16, #tpu.memory_space<vmem>>, %arg3: memref<18x96xf32, #tpu.memory_space<vmem>>, %arg4: memref<16x32xf32, #tpu.memory_space<vmem>>) attributes {dimension_semantics = [], scalar_prefetch = 0 : i64, scratch_operands = 0 : i64, tpu.core_type = #tpu.core_type<tc>} {
    %c0 = arith.constant 0 : index
    %c0_0 = arith.constant 0 : index
    %0 = vector.load %arg0[%c0, %c0_0] : memref<16x32xf32, #tpu.memory_space<vmem>>, vector<16x32xf32>
    %c0_1 = arith.constant 0 : index
    %c0_2 = arith.constant 0 : index
    %1 = vector.load %arg1[%c0_1, %c0_2] : memref<64x8xf32, #tpu.memory_space<vmem>>, vector<64x8xf32>
    %c0_3 = arith.constant 0 : index
    %c0_4 = arith.constant 0 : index
    %2 = vector.load %arg3[%c0_3, %c0_4] : memref<18x96xf32, #tpu.memory_space<vmem>>, vector<1x32xf32>
    %c1 = arith.constant 1 : index
    %c0_5 = arith.constant 0 : index
    %3 = vector.load %arg3[%c1, %c0_5] : memref<18x96xf32, #tpu.memory_space<vmem>>, vector<1x32xf32>
    %c2 = arith.constant 2 : index
    %c0_6 = arith.constant 0 : index
    %4 = vector.load %arg3[%c2, %c0_6] : memref<18x96xf32, #tpu.memory_space<vmem>>, vector<1x32xf32>
    %c3 = arith.constant 3 : index
    %c0_7 = arith.constant 0 : index
    %5 = vector.load %arg3[%c3, %c0_7] : memref<18x96xf32, #tpu.memory_space<vmem>>, vector<1x32xf32>
    %c4 = arith.constant 4 : index
    %c0_8 = arith.constant 0 : index
    %6 = vector.load %arg3[%c4, %c0_8] : memref<18x96xf32, #tpu.memory_space<vmem>>, vector<1x32xf32>
    %c5 = arith.constant 5 : index
    %c0_9 = arith.constant 0 : index
    %7 = vector.load %arg3[%c5, %c0_9] : memref<18x96xf32, #tpu.memory_space<vmem>>, vector<1x32xf32>
    %c6 = arith.constant 6 : index
    %c0_10 = arith.constant 0 : index
    %8 = vector.load %arg3[%c6, %c0_10] : memref<18x96xf32, #tpu.memory_space<vmem>>, vector<1x64xf32>
    %c7 = arith.constant 7 : index
    %c0_11 = arith.constant 0 : index
    %9 = vector.load %arg3[%c7, %c0_11] : memref<18x96xf32, #tpu.memory_space<vmem>>, vector<1x96xf32>
    %c0_12 = arith.constant 0 : index
    %c0_13 = arith.constant 0 : index
    %c0_14 = arith.constant 0 : index
    %10 = vector.load %arg2[%c0_12, %c0_13, %c0_14] : memref<2x160x96xbf16, #tpu.memory_space<vmem>>, vector<1x32x96xbf16>
    %11 = vector.shape_cast %10 : vector<1x32x96xbf16> to vector<32x96xbf16>
    %c0_15 = arith.constant 0 : index
    %c32 = arith.constant 32 : index
    %c0_16 = arith.constant 0 : index
    %12 = vector.load %arg2[%c0_15, %c32, %c0_16] : memref<2x160x96xbf16, #tpu.memory_space<vmem>>, vector<1x32x32xbf16>
    %13 = vector.shape_cast %12 : vector<1x32x32xbf16> to vector<32x32xbf16>
    %c0_17 = arith.constant 0 : index
    %c64 = arith.constant 64 : index
    %c0_18 = arith.constant 0 : index
    %14 = vector.load %arg2[%c0_17, %c64, %c0_18] : memref<2x160x96xbf16, #tpu.memory_space<vmem>>, vector<1x32x64xbf16>
    %15 = vector.shape_cast %14 : vector<1x32x64xbf16> to vector<32x64xbf16>
    %c0_19 = arith.constant 0 : index
    %c96 = arith.constant 96 : index
    %c0_20 = arith.constant 0 : index
    %16 = vector.load %arg2[%c0_19, %c96, %c0_20] : memref<2x160x96xbf16, #tpu.memory_space<vmem>>, vector<1x64x32xbf16>
    %17 = vector.shape_cast %16 : vector<1x64x32xbf16> to vector<64x32xbf16>
    %cst = arith.constant dense<0.000000e+00> : vector<16xf32>
    %18 = vector.multi_reduction <add>, %0, %cst [1] : vector<16x32xf32> to vector<16xf32>
    %19 = vector.shape_cast %18 : vector<16xf32> to vector<16x1xf32>
    %cst_21 = arith.constant 3.200000e+01 : f32
    %20 = vector.broadcast %cst_21 : f32 to vector<16x1xf32>
    %21 = arith.divf %19, %20 : vector<16x1xf32>
    %22 = vector.broadcast %21 : vector<16x1xf32> to vector<16x32xf32>
    %23 = arith.subf %0, %22 : vector<16x32xf32>
    %24 = arith.mulf %23, %23 : vector<16x32xf32>
    %cst_22 = arith.constant dense<0.000000e+00> : vector<16xf32>
    %25 = vector.multi_reduction <add>, %24, %cst_22 [1] : vector<16x32xf32> to vector<16xf32>
    %26 = vector.shape_cast %25 : vector<16xf32> to vector<16x1xf32>
    %cst_23 = arith.constant 0.0322580636 : f32
    %27 = vector.broadcast %cst_23 : f32 to vector<16x1xf32>
    %28 = arith.mulf %26, %27 : vector<16x1xf32>
    %29 = math.sqrt %28 : vector<16x1xf32>
    %cst_24 = arith.constant 9.99999997E-7 : f32
    %30 = vector.broadcast %cst_24 : f32 to vector<16x1xf32>
    %31 = arith.addf %29, %30 : vector<16x1xf32>
    %32 = tpu.reciprocal %31 {approx = true} : vector<16x1xf32> -> vector<16x1xf32>
    %33 = vector.broadcast %21 : vector<16x1xf32> to vector<16x32xf32>
    %34 = arith.subf %0, %33 : vector<16x32xf32>
    %35 = vector.broadcast %2 : vector<1x32xf32> to vector<16x32xf32>
    %36 = arith.mulf %35, %34 : vector<16x32xf32>
    %37 = vector.broadcast %32 : vector<16x1xf32> to vector<16x32xf32>
    %38 = arith.mulf %36, %37 : vector<16x32xf32>
    %39 = vector.broadcast %3 : vector<1x32xf32> to vector<16x32xf32>
    %40 = arith.addf %38, %39 : vector<16x32xf32>
    %41 = arith.truncf %40 : vector<16x32xf32> to vector<16x32xbf16>
    %cst_25 = arith.constant dense<0.000000e+00> : vector<16x96xf32>
    %42 = tpu.matmul %41, %11, %cst_25 {dimension_numbers = #tpu.dot_dimension_numbers<[1], [0], [0], [1], [0, 0, 1, 1], [], []>} : vector<16x32xbf16>, vector<32x96xbf16>, vector<16x96xf32> -> vector<16x96xf32>
    %43 = vector.broadcast %9 : vector<1x96xf32> to vector<16x96xf32>
    %44 = arith.addf %42, %43 : vector<16x96xf32>
    %45 = vector.extract_strided_slice %44 {offsets = [0, 0], sizes = [8, 8], strides = [1, 1]} : vector<16x96xf32> to vector<8x8xf32>
    %46 = arith.truncf %45 : vector<8x8xf32> to vector<8x8xbf16>
    %47 = vector.extract_strided_slice %44 {offsets = [0, 32], sizes = [8, 8], strides = [1, 1]} : vector<16x96xf32> to vector<8x8xf32>
    %48 = arith.truncf %47 : vector<8x8xf32> to vector<8x8xbf16>
    %cst_26 = arith.constant dense<0.000000e+00> : vector<8x8xf32>
    %49 = tpu.matmul %46, %48, %cst_26 {dimension_numbers = #tpu.dot_dimension_numbers<[1], [1], [0], [0], [0, 0, 1, 0], [], []>} : vector<8x8xbf16>, vector<8x8xbf16>, vector<8x8xf32> -> vector<8x8xf32>
    %50 = vector.extract_strided_slice %44 {offsets = [0, 8], sizes = [8, 8], strides = [1, 1]} : vector<16x96xf32> to vector<8x8xf32>
    %51 = arith.truncf %50 : vector<8x8xf32> to vector<8x8xbf16>
    %52 = vector.extract_strided_slice %44 {offsets = [0, 40], sizes = [8, 8], strides = [1, 1]} : vector<16x96xf32> to vector<8x8xf32>
    %53 = arith.truncf %52 : vector<8x8xf32> to vector<8x8xbf16>
    %cst_27 = arith.constant dense<0.000000e+00> : vector<8x8xf32>
    %54 = tpu.matmul %51, %53, %cst_27 {dimension_numbers = #tpu.dot_dimension_numbers<[1], [1], [0], [0], [0, 0, 1, 0], [], []>} : vector<8x8xbf16>, vector<8x8xbf16>, vector<8x8xf32> -> vector<8x8xf32>
    %55 = vector.extract_strided_slice %44 {offsets = [0, 16], sizes = [8, 8], strides = [1, 1]} : vector<16x96xf32> to vector<8x8xf32>
    %56 = arith.truncf %55 : vector<8x8xf32> to vector<8x8xbf16>
    %57 = vector.extract_strided_slice %44 {offsets = [0, 48], sizes = [8, 8], strides = [1, 1]} : vector<16x96xf32> to vector<8x8xf32>
    %58 = arith.truncf %57 : vector<8x8xf32> to vector<8x8xbf16>
    %cst_28 = arith.constant dense<0.000000e+00> : vector<8x8xf32>
    %59 = tpu.matmul %56, %58, %cst_28 {dimension_numbers = #tpu.dot_dimension_numbers<[1], [1], [0], [0], [0, 0, 1, 0], [], []>} : vector<8x8xbf16>, vector<8x8xbf16>, vector<8x8xf32> -> vector<8x8xf32>
    %60 = vector.extract_strided_slice %44 {offsets = [0, 24], sizes = [8, 8], strides = [1, 1]} : vector<16x96xf32> to vector<8x8xf32>
    %61 = arith.truncf %60 : vector<8x8xf32> to vector<8x8xbf16>
    %62 = vector.extract_strided_slice %44 {offsets = [0, 56], sizes = [8, 8], strides = [1, 1]} : vector<16x96xf32> to vector<8x8xf32>
    %63 = arith.truncf %62 : vector<8x8xf32> to vector<8x8xbf16>
    %cst_29 = arith.constant dense<0.000000e+00> : vector<8x8xf32>
    %64 = tpu.matmul %61, %63, %cst_29 {dimension_numbers = #tpu.dot_dimension_numbers<[1], [1], [0], [0], [0, 0, 1, 0], [], []>} : vector<8x8xbf16>, vector<8x8xbf16>, vector<8x8xf32> -> vector<8x8xf32>
    %65 = vector.extract_strided_slice %44 {offsets = [8, 0], sizes = [8, 8], strides = [1, 1]} : vector<16x96xf32> to vector<8x8xf32>
    %66 = arith.truncf %65 : vector<8x8xf32> to vector<8x8xbf16>
    %67 = vector.extract_strided_slice %44 {offsets = [8, 32], sizes = [8, 8], strides = [1, 1]} : vector<16x96xf32> to vector<8x8xf32>
    %68 = arith.truncf %67 : vector<8x8xf32> to vector<8x8xbf16>
    %cst_30 = arith.constant dense<0.000000e+00> : vector<8x8xf32>
    %69 = tpu.matmul %66, %68, %cst_30 {dimension_numbers = #tpu.dot_dimension_numbers<[1], [1], [0], [0], [0, 0, 1, 0], [], []>} : vector<8x8xbf16>, vector<8x8xbf16>, vector<8x8xf32> -> vector<8x8xf32>
    %70 = vector.extract_strided_slice %44 {offsets = [8, 8], sizes = [8, 8], strides = [1, 1]} : vector<16x96xf32> to vector<8x8xf32>
    %71 = arith.truncf %70 : vector<8x8xf32> to vector<8x8xbf16>
    %72 = vector.extract_strided_slice %44 {offsets = [8, 40], sizes = [8, 8], strides = [1, 1]} : vector<16x96xf32> to vector<8x8xf32>
    %73 = arith.truncf %72 : vector<8x8xf32> to vector<8x8xbf16>
    %cst_31 = arith.constant dense<0.000000e+00> : vector<8x8xf32>
    %74 = tpu.matmul %71, %73, %cst_31 {dimension_numbers = #tpu.dot_dimension_numbers<[1], [1], [0], [0], [0, 0, 1, 0], [], []>} : vector<8x8xbf16>, vector<8x8xbf16>, vector<8x8xf32> -> vector<8x8xf32>
    %75 = vector.extract_strided_slice %44 {offsets = [8, 16], sizes = [8, 8], strides = [1, 1]} : vector<16x96xf32> to vector<8x8xf32>
    %76 = arith.truncf %75 : vector<8x8xf32> to vector<8x8xbf16>
    %77 = vector.extract_strided_slice %44 {offsets = [8, 48], sizes = [8, 8], strides = [1, 1]} : vector<16x96xf32> to vector<8x8xf32>
    %78 = arith.truncf %77 : vector<8x8xf32> to vector<8x8xbf16>
    %cst_32 = arith.constant dense<0.000000e+00> : vector<8x8xf32>
    %79 = tpu.matmul %76, %78, %cst_32 {dimension_numbers = #tpu.dot_dimension_numbers<[1], [1], [0], [0], [0, 0, 1, 0], [], []>} : vector<8x8xbf16>, vector<8x8xbf16>, vector<8x8xf32> -> vector<8x8xf32>
    %80 = vector.extract_strided_slice %44 {offsets = [8, 24], sizes = [8, 8], strides = [1, 1]} : vector<16x96xf32> to vector<8x8xf32>
    %81 = arith.truncf %80 : vector<8x8xf32> to vector<8x8xbf16>
    %82 = vector.extract_strided_slice %44 {offsets = [8, 56], sizes = [8, 8], strides = [1, 1]} : vector<16x96xf32> to vector<8x8xf32>
    %83 = arith.truncf %82 : vector<8x8xf32> to vector<8x8xbf16>
    %cst_33 = arith.constant dense<0.000000e+00> : vector<8x8xf32>
    %84 = tpu.matmul %81, %83, %cst_33 {dimension_numbers = #tpu.dot_dimension_numbers<[1], [1], [0], [0], [0, 0, 1, 0], [], []>} : vector<8x8xbf16>, vector<8x8xbf16>, vector<8x8xf32> -> vector<8x8xf32>
    %85 = tpu.concatenate %49, %54, %59, %64, %69, %74, %79, %84 in 0 : vector<8x8xf32>, vector<8x8xf32>, vector<8x8xf32>, vector<8x8xf32>, vector<8x8xf32>, vector<8x8xf32>, vector<8x8xf32>, vector<8x8xf32> -> vector<64x8xf32>
    %86 = arith.addf %85, %1 : vector<64x8xf32>
    %cst_34 = arith.constant dense<0xFF800000> : vector<64xf32>
    %87 = vector.multi_reduction <maximumf>, %86, %cst_34 [1] : vector<64x8xf32> to vector<64xf32>
    %88 = vector.shape_cast %87 : vector<64xf32> to vector<64x1xf32>
    %89 = vector.broadcast %88 : vector<64x1xf32> to vector<64x8xf32>
    %90 = arith.subf %86, %89 : vector<64x8xf32>
    %91 = math.exp %90 : vector<64x8xf32>
    %cst_35 = arith.constant dense<0.000000e+00> : vector<64xf32>
    %92 = vector.multi_reduction <add>, %91, %cst_35 [1] : vector<64x8xf32> to vector<64xf32>
    %93 = vector.shape_cast %92 : vector<64xf32> to vector<64x1xf32>
    %94 = tpu.reciprocal %93 {approx = true} : vector<64x1xf32> -> vector<64x1xf32>
    %95 = vector.broadcast %94 : vector<64x1xf32> to vector<64x8xf32>
    %96 = arith.mulf %91, %95 : vector<64x8xf32>
    %97 = vector.extract_strided_slice %96 {offsets = [0, 0], sizes = [8, 8], strides = [1, 1]} : vector<64x8xf32> to vector<8x8xf32>
    %98 = arith.truncf %97 : vector<8x8xf32> to vector<8x8xbf16>
    %99 = vector.extract_strided_slice %44 {offsets = [0, 64], sizes = [8, 8], strides = [1, 1]} : vector<16x96xf32> to vector<8x8xf32>
    %100 = arith.truncf %99 : vector<8x8xf32> to vector<8x8xbf16>
    %cst_36 = arith.constant dense<0.000000e+00> : vector<8x8xf32>
    %101 = tpu.matmul %98, %100, %cst_36 {dimension_numbers = #tpu.dot_dimension_numbers<[1], [0], [0], [1], [0, 0, 1, 1], [], []>} : vector<8x8xbf16>, vector<8x8xbf16>, vector<8x8xf32> -> vector<8x8xf32>
    %102 = vector.extract_strided_slice %96 {offsets = [8, 0], sizes = [8, 8], strides = [1, 1]} : vector<64x8xf32> to vector<8x8xf32>
    %103 = arith.truncf %102 : vector<8x8xf32> to vector<8x8xbf16>
    %104 = vector.extract_strided_slice %44 {offsets = [0, 72], sizes = [8, 8], strides = [1, 1]} : vector<16x96xf32> to vector<8x8xf32>
    %105 = arith.truncf %104 : vector<8x8xf32> to vector<8x8xbf16>
    %cst_37 = arith.constant dense<0.000000e+00> : vector<8x8xf32>
    %106 = tpu.matmul %103, %105, %cst_37 {dimension_numbers = #tpu.dot_dimension_numbers<[1], [0], [0], [1], [0, 0, 1, 1], [], []>} : vector<8x8xbf16>, vector<8x8xbf16>, vector<8x8xf32> -> vector<8x8xf32>
    %107 = vector.extract_strided_slice %96 {offsets = [16, 0], sizes = [8, 8], strides = [1, 1]} : vector<64x8xf32> to vector<8x8xf32>
    %108 = arith.truncf %107 : vector<8x8xf32> to vector<8x8xbf16>
    %109 = vector.extract_strided_slice %44 {offsets = [0, 80], sizes = [8, 8], strides = [1, 1]} : vector<16x96xf32> to vector<8x8xf32>
    %110 = arith.truncf %109 : vector<8x8xf32> to vector<8x8xbf16>
    %cst_38 = arith.constant dense<0.000000e+00> : vector<8x8xf32>
    %111 = tpu.matmul %108, %110, %cst_38 {dimension_numbers = #tpu.dot_dimension_numbers<[1], [0], [0], [1], [0, 0, 1, 1], [], []>} : vector<8x8xbf16>, vector<8x8xbf16>, vector<8x8xf32> -> vector<8x8xf32>
    %112 = vector.extract_strided_slice %96 {offsets = [24, 0], sizes = [8, 8], strides = [1, 1]} : vector<64x8xf32> to vector<8x8xf32>
    %113 = arith.truncf %112 : vector<8x8xf32> to vector<8x8xbf16>
    %114 = vector.extract_strided_slice %44 {offsets = [0, 88], sizes = [8, 8], strides = [1, 1]} : vector<16x96xf32> to vector<8x8xf32>
    %115 = arith.truncf %114 : vector<8x8xf32> to vector<8x8xbf16>
    %cst_39 = arith.constant dense<0.000000e+00> : vector<8x8xf32>
    %116 = tpu.matmul %113, %115, %cst_39 {dimension_numbers = #tpu.dot_dimension_numbers<[1], [0], [0], [1], [0, 0, 1, 1], [], []>} : vector<8x8xbf16>, vector<8x8xbf16>, vector<8x8xf32> -> vector<8x8xf32>
    %117 = tpu.concatenate %101, %106, %111, %116 in 1 : vector<8x8xf32>, vector<8x8xf32>, vector<8x8xf32>, vector<8x8xf32> -> vector<8x32xf32>
    %118 = vector.extract_strided_slice %96 {offsets = [32, 0], sizes = [8, 8], strides = [1, 1]} : vector<64x8xf32> to vector<8x8xf32>
    %119 = arith.truncf %118 : vector<8x8xf32> to vector<8x8xbf16>
    %120 = vector.extract_strided_slice %44 {offsets = [8, 64], sizes = [8, 8], strides = [1, 1]} : vector<16x96xf32> to vector<8x8xf32>
    %121 = arith.truncf %120 : vector<8x8xf32> to vector<8x8xbf16>
    %cst_40 = arith.constant dense<0.000000e+00> : vector<8x8xf32>
    %122 = tpu.matmul %119, %121, %cst_40 {dimension_numbers = #tpu.dot_dimension_numbers<[1], [0], [0], [1], [0, 0, 1, 1], [], []>} : vector<8x8xbf16>, vector<8x8xbf16>, vector<8x8xf32> -> vector<8x8xf32>
    %123 = vector.extract_strided_slice %96 {offsets = [40, 0], sizes = [8, 8], strides = [1, 1]} : vector<64x8xf32> to vector<8x8xf32>
    %124 = arith.truncf %123 : vector<8x8xf32> to vector<8x8xbf16>
    %125 = vector.extract_strided_slice %44 {offsets = [8, 72], sizes = [8, 8], strides = [1, 1]} : vector<16x96xf32> to vector<8x8xf32>
    %126 = arith.truncf %125 : vector<8x8xf32> to vector<8x8xbf16>
    %cst_41 = arith.constant dense<0.000000e+00> : vector<8x8xf32>
    %127 = tpu.matmul %124, %126, %cst_41 {dimension_numbers = #tpu.dot_dimension_numbers<[1], [0], [0], [1], [0, 0, 1, 1], [], []>} : vector<8x8xbf16>, vector<8x8xbf16>, vector<8x8xf32> -> vector<8x8xf32>
    %128 = vector.extract_strided_slice %96 {offsets = [48, 0], sizes = [8, 8], strides = [1, 1]} : vector<64x8xf32> to vector<8x8xf32>
    %129 = arith.truncf %128 : vector<8x8xf32> to vector<8x8xbf16>
    %130 = vector.extract_strided_slice %44 {offsets = [8, 80], sizes = [8, 8], strides = [1, 1]} : vector<16x96xf32> to vector<8x8xf32>
    %131 = arith.truncf %130 : vector<8x8xf32> to vector<8x8xbf16>
    %cst_42 = arith.constant dense<0.000000e+00> : vector<8x8xf32>
    %132 = tpu.matmul %129, %131, %cst_42 {dimension_numbers = #tpu.dot_dimension_numbers<[1], [0], [0], [1], [0, 0, 1, 1], [], []>} : vector<8x8xbf16>, vector<8x8xbf16>, vector<8x8xf32> -> vector<8x8xf32>
    %133 = vector.extract_strided_slice %96 {offsets = [56, 0], sizes = [8, 8], strides = [1, 1]} : vector<64x8xf32> to vector<8x8xf32>
    %134 = arith.truncf %133 : vector<8x8xf32> to vector<8x8xbf16>
    %135 = vector.extract_strided_slice %44 {offsets = [8, 88], sizes = [8, 8], strides = [1, 1]} : vector<16x96xf32> to vector<8x8xf32>
    %136 = arith.truncf %135 : vector<8x8xf32> to vector<8x8xbf16>
    %cst_43 = arith.constant dense<0.000000e+00> : vector<8x8xf32>
    %137 = tpu.matmul %134, %136, %cst_43 {dimension_numbers = #tpu.dot_dimension_numbers<[1], [0], [0], [1], [0, 0, 1, 1], [], []>} : vector<8x8xbf16>, vector<8x8xbf16>, vector<8x8xf32> -> vector<8x8xf32>
    %138 = tpu.concatenate %122, %127, %132, %137 in 1 : vector<8x8xf32>, vector<8x8xf32>, vector<8x8xf32>, vector<8x8xf32> -> vector<8x32xf32>
    %139 = tpu.concatenate %117, %138 in 0 : vector<8x32xf32>, vector<8x32xf32> -> vector<16x32xf32>
    %140 = arith.truncf %139 : vector<16x32xf32> to vector<16x32xbf16>
    %cst_44 = arith.constant dense<0.000000e+00> : vector<16x32xf32>
    %141 = tpu.matmul %140, %13, %cst_44 {dimension_numbers = #tpu.dot_dimension_numbers<[1], [0], [0], [1], [0, 0, 1, 1], [], []>} : vector<16x32xbf16>, vector<32x32xbf16>, vector<16x32xf32> -> vector<16x32xf32>
    %142 = vector.broadcast %6 : vector<1x32xf32> to vector<16x32xf32>
    %143 = arith.addf %141, %142 : vector<16x32xf32>
    %144 = arith.addf %0, %143 : vector<16x32xf32>
    %cst_45 = arith.constant dense<0.000000e+00> : vector<16xf32>
    %145 = vector.multi_reduction <add>, %144, %cst_45 [1] : vector<16x32xf32> to vector<16xf32>
    %146 = vector.shape_cast %145 : vector<16xf32> to vector<16x1xf32>
    %cst_46 = arith.constant 3.200000e+01 : f32
    %147 = vector.broadcast %cst_46 : f32 to vector<16x1xf32>
    %148 = arith.divf %146, %147 : vector<16x1xf32>
    %149 = vector.broadcast %148 : vector<16x1xf32> to vector<16x32xf32>
    %150 = arith.subf %144, %149 : vector<16x32xf32>
    %151 = arith.mulf %150, %150 : vector<16x32xf32>
    %cst_47 = arith.constant dense<0.000000e+00> : vector<16xf32>
    %152 = vector.multi_reduction <add>, %151, %cst_47 [1] : vector<16x32xf32> to vector<16xf32>
    %153 = vector.shape_cast %152 : vector<16xf32> to vector<16x1xf32>
    %cst_48 = arith.constant 0.0322580636 : f32
    %154 = vector.broadcast %cst_48 : f32 to vector<16x1xf32>
    %155 = arith.mulf %153, %154 : vector<16x1xf32>
    %156 = math.sqrt %155 : vector<16x1xf32>
    %cst_49 = arith.constant 9.99999997E-7 : f32
    %157 = vector.broadcast %cst_49 : f32 to vector<16x1xf32>
    %158 = arith.addf %156, %157 : vector<16x1xf32>
    %159 = tpu.reciprocal %158 {approx = true} : vector<16x1xf32> -> vector<16x1xf32>
    %160 = vector.broadcast %148 : vector<16x1xf32> to vector<16x32xf32>
    %161 = arith.subf %144, %160 : vector<16x32xf32>
    %162 = vector.broadcast %4 : vector<1x32xf32> to vector<16x32xf32>
    %163 = arith.mulf %162, %161 : vector<16x32xf32>
    %164 = vector.broadcast %159 : vector<16x1xf32> to vector<16x32xf32>
    %165 = arith.mulf %163, %164 : vector<16x32xf32>
    %166 = vector.broadcast %5 : vector<1x32xf32> to vector<16x32xf32>
    %167 = arith.addf %165, %166 : vector<16x32xf32>
    %168 = arith.truncf %167 : vector<16x32xf32> to vector<16x32xbf16>
    %cst_50 = arith.constant dense<0.000000e+00> : vector<16x64xf32>
    %169 = tpu.matmul %168, %15, %cst_50 {dimension_numbers = #tpu.dot_dimension_numbers<[1], [0], [0], [1], [0, 0, 1, 1], [], []>} : vector<16x32xbf16>, vector<32x64xbf16>, vector<16x64xf32> -> vector<16x64xf32>
    %170 = vector.broadcast %8 : vector<1x64xf32> to vector<16x64xf32>
    %171 = arith.addf %169, %170 : vector<16x64xf32>
    %cst_51 = arith.constant 0.000000e+00 : f32
    %172 = vector.broadcast %cst_51 : f32 to vector<16x64xf32>
    %173 = arith.maximumf %171, %172 : vector<16x64xf32>
    %174 = arith.truncf %173 : vector<16x64xf32> to vector<16x64xbf16>
    %cst_52 = arith.constant dense<0.000000e+00> : vector<16x32xf32>
    %175 = tpu.matmul %174, %17, %cst_52 {dimension_numbers = #tpu.dot_dimension_numbers<[1], [0], [0], [1], [0, 0, 1, 1], [], []>} : vector<16x64xbf16>, vector<64x32xbf16>, vector<16x32xf32> -> vector<16x32xf32>
    %176 = vector.broadcast %7 : vector<1x32xf32> to vector<16x32xf32>
    %177 = arith.addf %175, %176 : vector<16x32xf32>
    %178 = arith.addf %144, %177 : vector<16x32xf32>
    %c8 = arith.constant 8 : index
    %c0_53 = arith.constant 0 : index
    %179 = vector.load %arg3[%c8, %c0_53] : memref<18x96xf32, #tpu.memory_space<vmem>>, vector<1x32xf32>
    %c9 = arith.constant 9 : index
    %c0_54 = arith.constant 0 : index
    %180 = vector.load %arg3[%c9, %c0_54] : memref<18x96xf32, #tpu.memory_space<vmem>>, vector<1x32xf32>
    %c10 = arith.constant 10 : index
    %c0_55 = arith.constant 0 : index
    %181 = vector.load %arg3[%c10, %c0_55] : memref<18x96xf32, #tpu.memory_space<vmem>>, vector<1x32xf32>
    %c11 = arith.constant 11 : index
    %c0_56 = arith.constant 0 : index
    %182 = vector.load %arg3[%c11, %c0_56] : memref<18x96xf32, #tpu.memory_space<vmem>>, vector<1x32xf32>
    %c12 = arith.constant 12 : index
    %c0_57 = arith.constant 0 : index
    %183 = vector.load %arg3[%c12, %c0_57] : memref<18x96xf32, #tpu.memory_space<vmem>>, vector<1x32xf32>
    %c13 = arith.constant 13 : index
    %c0_58 = arith.constant 0 : index
    %184 = vector.load %arg3[%c13, %c0_58] : memref<18x96xf32, #tpu.memory_space<vmem>>, vector<1x32xf32>
    %c14 = arith.constant 14 : index
    %c0_59 = arith.constant 0 : index
    %185 = vector.load %arg3[%c14, %c0_59] : memref<18x96xf32, #tpu.memory_space<vmem>>, vector<1x64xf32>
    %c15 = arith.constant 15 : index
    %c0_60 = arith.constant 0 : index
    %186 = vector.load %arg3[%c15, %c0_60] : memref<18x96xf32, #tpu.memory_space<vmem>>, vector<1x96xf32>
    %c1_61 = arith.constant 1 : index
    %c0_62 = arith.constant 0 : index
    %c0_63 = arith.constant 0 : index
    %187 = vector.load %arg2[%c1_61, %c0_62, %c0_63] : memref<2x160x96xbf16, #tpu.memory_space<vmem>>, vector<1x32x96xbf16>
    %188 = vector.shape_cast %187 : vector<1x32x96xbf16> to vector<32x96xbf16>
    %c1_64 = arith.constant 1 : index
    %c32_65 = arith.constant 32 : index
    %c0_66 = arith.constant 0 : index
    %189 = vector.load %arg2[%c1_64, %c32_65, %c0_66] : memref<2x160x96xbf16, #tpu.memory_space<vmem>>, vector<1x32x32xbf16>
    %190 = vector.shape_cast %189 : vector<1x32x32xbf16> to vector<32x32xbf16>
    %c1_67 = arith.constant 1 : index
    %c64_68 = arith.constant 64 : index
    %c0_69 = arith.constant 0 : index
    %191 = vector.load %arg2[%c1_67, %c64_68, %c0_69] : memref<2x160x96xbf16, #tpu.memory_space<vmem>>, vector<1x32x64xbf16>
    %192 = vector.shape_cast %191 : vector<1x32x64xbf16> to vector<32x64xbf16>
    %c1_70 = arith.constant 1 : index
    %c96_71 = arith.constant 96 : index
    %c0_72 = arith.constant 0 : index
    %193 = vector.load %arg2[%c1_70, %c96_71, %c0_72] : memref<2x160x96xbf16, #tpu.memory_space<vmem>>, vector<1x64x32xbf16>
    %194 = vector.shape_cast %193 : vector<1x64x32xbf16> to vector<64x32xbf16>
    %cst_73 = arith.constant dense<0.000000e+00> : vector<16xf32>
    %195 = vector.multi_reduction <add>, %178, %cst_73 [1] : vector<16x32xf32> to vector<16xf32>
    %196 = vector.shape_cast %195 : vector<16xf32> to vector<16x1xf32>
    %cst_74 = arith.constant 3.200000e+01 : f32
    %197 = vector.broadcast %cst_74 : f32 to vector<16x1xf32>
    %198 = arith.divf %196, %197 : vector<16x1xf32>
    %199 = vector.broadcast %198 : vector<16x1xf32> to vector<16x32xf32>
    %200 = arith.subf %178, %199 : vector<16x32xf32>
    %201 = arith.mulf %200, %200 : vector<16x32xf32>
    %cst_75 = arith.constant dense<0.000000e+00> : vector<16xf32>
    %202 = vector.multi_reduction <add>, %201, %cst_75 [1] : vector<16x32xf32> to vector<16xf32>
    %203 = vector.shape_cast %202 : vector<16xf32> to vector<16x1xf32>
    %cst_76 = arith.constant 0.0322580636 : f32
    %204 = vector.broadcast %cst_76 : f32 to vector<16x1xf32>
    %205 = arith.mulf %203, %204 : vector<16x1xf32>
    %206 = math.sqrt %205 : vector<16x1xf32>
    %cst_77 = arith.constant 9.99999997E-7 : f32
    %207 = vector.broadcast %cst_77 : f32 to vector<16x1xf32>
    %208 = arith.addf %206, %207 : vector<16x1xf32>
    %209 = tpu.reciprocal %208 {approx = true} : vector<16x1xf32> -> vector<16x1xf32>
    %210 = vector.broadcast %198 : vector<16x1xf32> to vector<16x32xf32>
    %211 = arith.subf %178, %210 : vector<16x32xf32>
    %212 = vector.broadcast %179 : vector<1x32xf32> to vector<16x32xf32>
    %213 = arith.mulf %212, %211 : vector<16x32xf32>
    %214 = vector.broadcast %209 : vector<16x1xf32> to vector<16x32xf32>
    %215 = arith.mulf %213, %214 : vector<16x32xf32>
    %216 = vector.broadcast %180 : vector<1x32xf32> to vector<16x32xf32>
    %217 = arith.addf %215, %216 : vector<16x32xf32>
    %218 = arith.truncf %217 : vector<16x32xf32> to vector<16x32xbf16>
    %cst_78 = arith.constant dense<0.000000e+00> : vector<16x96xf32>
    %219 = tpu.matmul %218, %188, %cst_78 {dimension_numbers = #tpu.dot_dimension_numbers<[1], [0], [0], [1], [0, 0, 1, 1], [], []>} : vector<16x32xbf16>, vector<32x96xbf16>, vector<16x96xf32> -> vector<16x96xf32>
    %220 = vector.broadcast %186 : vector<1x96xf32> to vector<16x96xf32>
    %221 = arith.addf %219, %220 : vector<16x96xf32>
    %222 = vector.extract_strided_slice %221 {offsets = [0, 0], sizes = [8, 8], strides = [1, 1]} : vector<16x96xf32> to vector<8x8xf32>
    %223 = arith.truncf %222 : vector<8x8xf32> to vector<8x8xbf16>
    %224 = vector.extract_strided_slice %221 {offsets = [0, 32], sizes = [8, 8], strides = [1, 1]} : vector<16x96xf32> to vector<8x8xf32>
    %225 = arith.truncf %224 : vector<8x8xf32> to vector<8x8xbf16>
    %cst_79 = arith.constant dense<0.000000e+00> : vector<8x8xf32>
    %226 = tpu.matmul %223, %225, %cst_79 {dimension_numbers = #tpu.dot_dimension_numbers<[1], [1], [0], [0], [0, 0, 1, 0], [], []>} : vector<8x8xbf16>, vector<8x8xbf16>, vector<8x8xf32> -> vector<8x8xf32>
    %227 = vector.extract_strided_slice %221 {offsets = [0, 8], sizes = [8, 8], strides = [1, 1]} : vector<16x96xf32> to vector<8x8xf32>
    %228 = arith.truncf %227 : vector<8x8xf32> to vector<8x8xbf16>
    %229 = vector.extract_strided_slice %221 {offsets = [0, 40], sizes = [8, 8], strides = [1, 1]} : vector<16x96xf32> to vector<8x8xf32>
    %230 = arith.truncf %229 : vector<8x8xf32> to vector<8x8xbf16>
    %cst_80 = arith.constant dense<0.000000e+00> : vector<8x8xf32>
    %231 = tpu.matmul %228, %230, %cst_80 {dimension_numbers = #tpu.dot_dimension_numbers<[1], [1], [0], [0], [0, 0, 1, 0], [], []>} : vector<8x8xbf16>, vector<8x8xbf16>, vector<8x8xf32> -> vector<8x8xf32>
    %232 = vector.extract_strided_slice %221 {offsets = [0, 16], sizes = [8, 8], strides = [1, 1]} : vector<16x96xf32> to vector<8x8xf32>
    %233 = arith.truncf %232 : vector<8x8xf32> to vector<8x8xbf16>
    %234 = vector.extract_strided_slice %221 {offsets = [0, 48], sizes = [8, 8], strides = [1, 1]} : vector<16x96xf32> to vector<8x8xf32>
    %235 = arith.truncf %234 : vector<8x8xf32> to vector<8x8xbf16>
    %cst_81 = arith.constant dense<0.000000e+00> : vector<8x8xf32>
    %236 = tpu.matmul %233, %235, %cst_81 {dimension_numbers = #tpu.dot_dimension_numbers<[1], [1], [0], [0], [0, 0, 1, 0], [], []>} : vector<8x8xbf16>, vector<8x8xbf16>, vector<8x8xf32> -> vector<8x8xf32>
    %237 = vector.extract_strided_slice %221 {offsets = [0, 24], sizes = [8, 8], strides = [1, 1]} : vector<16x96xf32> to vector<8x8xf32>
    %238 = arith.truncf %237 : vector<8x8xf32> to vector<8x8xbf16>
    %239 = vector.extract_strided_slice %221 {offsets = [0, 56], sizes = [8, 8], strides = [1, 1]} : vector<16x96xf32> to vector<8x8xf32>
    %240 = arith.truncf %239 : vector<8x8xf32> to vector<8x8xbf16>
    %cst_82 = arith.constant dense<0.000000e+00> : vector<8x8xf32>
    %241 = tpu.matmul %238, %240, %cst_82 {dimension_numbers = #tpu.dot_dimension_numbers<[1], [1], [0], [0], [0, 0, 1, 0], [], []>} : vector<8x8xbf16>, vector<8x8xbf16>, vector<8x8xf32> -> vector<8x8xf32>
    %242 = vector.extract_strided_slice %221 {offsets = [8, 0], sizes = [8, 8], strides = [1, 1]} : vector<16x96xf32> to vector<8x8xf32>
    %243 = arith.truncf %242 : vector<8x8xf32> to vector<8x8xbf16>
    %244 = vector.extract_strided_slice %221 {offsets = [8, 32], sizes = [8, 8], strides = [1, 1]} : vector<16x96xf32> to vector<8x8xf32>
    %245 = arith.truncf %244 : vector<8x8xf32> to vector<8x8xbf16>
    %cst_83 = arith.constant dense<0.000000e+00> : vector<8x8xf32>
    %246 = tpu.matmul %243, %245, %cst_83 {dimension_numbers = #tpu.dot_dimension_numbers<[1], [1], [0], [0], [0, 0, 1, 0], [], []>} : vector<8x8xbf16>, vector<8x8xbf16>, vector<8x8xf32> -> vector<8x8xf32>
    %247 = vector.extract_strided_slice %221 {offsets = [8, 8], sizes = [8, 8], strides = [1, 1]} : vector<16x96xf32> to vector<8x8xf32>
    %248 = arith.truncf %247 : vector<8x8xf32> to vector<8x8xbf16>
    %249 = vector.extract_strided_slice %221 {offsets = [8, 40], sizes = [8, 8], strides = [1, 1]} : vector<16x96xf32> to vector<8x8xf32>
    %250 = arith.truncf %249 : vector<8x8xf32> to vector<8x8xbf16>
    %cst_84 = arith.constant dense<0.000000e+00> : vector<8x8xf32>
    %251 = tpu.matmul %248, %250, %cst_84 {dimension_numbers = #tpu.dot_dimension_numbers<[1], [1], [0], [0], [0, 0, 1, 0], [], []>} : vector<8x8xbf16>, vector<8x8xbf16>, vector<8x8xf32> -> vector<8x8xf32>
    %252 = vector.extract_strided_slice %221 {offsets = [8, 16], sizes = [8, 8], strides = [1, 1]} : vector<16x96xf32> to vector<8x8xf32>
    %253 = arith.truncf %252 : vector<8x8xf32> to vector<8x8xbf16>
    %254 = vector.extract_strided_slice %221 {offsets = [8, 48], sizes = [8, 8], strides = [1, 1]} : vector<16x96xf32> to vector<8x8xf32>
    %255 = arith.truncf %254 : vector<8x8xf32> to vector<8x8xbf16>
    %cst_85 = arith.constant dense<0.000000e+00> : vector<8x8xf32>
    %256 = tpu.matmul %253, %255, %cst_85 {dimension_numbers = #tpu.dot_dimension_numbers<[1], [1], [0], [0], [0, 0, 1, 0], [], []>} : vector<8x8xbf16>, vector<8x8xbf16>, vector<8x8xf32> -> vector<8x8xf32>
    %257 = vector.extract_strided_slice %221 {offsets = [8, 24], sizes = [8, 8], strides = [1, 1]} : vector<16x96xf32> to vector<8x8xf32>
    %258 = arith.truncf %257 : vector<8x8xf32> to vector<8x8xbf16>
    %259 = vector.extract_strided_slice %221 {offsets = [8, 56], sizes = [8, 8], strides = [1, 1]} : vector<16x96xf32> to vector<8x8xf32>
    %260 = arith.truncf %259 : vector<8x8xf32> to vector<8x8xbf16>
    %cst_86 = arith.constant dense<0.000000e+00> : vector<8x8xf32>
    %261 = tpu.matmul %258, %260, %cst_86 {dimension_numbers = #tpu.dot_dimension_numbers<[1], [1], [0], [0], [0, 0, 1, 0], [], []>} : vector<8x8xbf16>, vector<8x8xbf16>, vector<8x8xf32> -> vector<8x8xf32>
    %262 = tpu.concatenate %226, %231, %236, %241, %246, %251, %256, %261 in 0 : vector<8x8xf32>, vector<8x8xf32>, vector<8x8xf32>, vector<8x8xf32>, vector<8x8xf32>, vector<8x8xf32>, vector<8x8xf32>, vector<8x8xf32> -> vector<64x8xf32>
    %263 = arith.addf %262, %1 : vector<64x8xf32>
    %cst_87 = arith.constant dense<0xFF800000> : vector<64xf32>
    %264 = vector.multi_reduction <maximumf>, %263, %cst_87 [1] : vector<64x8xf32> to vector<64xf32>
    %265 = vector.shape_cast %264 : vector<64xf32> to vector<64x1xf32>
    %266 = vector.broadcast %265 : vector<64x1xf32> to vector<64x8xf32>
    %267 = arith.subf %263, %266 : vector<64x8xf32>
    %268 = math.exp %267 : vector<64x8xf32>
    %cst_88 = arith.constant dense<0.000000e+00> : vector<64xf32>
    %269 = vector.multi_reduction <add>, %268, %cst_88 [1] : vector<64x8xf32> to vector<64xf32>
    %270 = vector.shape_cast %269 : vector<64xf32> to vector<64x1xf32>
    %271 = tpu.reciprocal %270 {approx = true} : vector<64x1xf32> -> vector<64x1xf32>
    %272 = vector.broadcast %271 : vector<64x1xf32> to vector<64x8xf32>
    %273 = arith.mulf %268, %272 : vector<64x8xf32>
    %274 = vector.extract_strided_slice %273 {offsets = [0, 0], sizes = [8, 8], strides = [1, 1]} : vector<64x8xf32> to vector<8x8xf32>
    %275 = arith.truncf %274 : vector<8x8xf32> to vector<8x8xbf16>
    %276 = vector.extract_strided_slice %221 {offsets = [0, 64], sizes = [8, 8], strides = [1, 1]} : vector<16x96xf32> to vector<8x8xf32>
    %277 = arith.truncf %276 : vector<8x8xf32> to vector<8x8xbf16>
    %cst_89 = arith.constant dense<0.000000e+00> : vector<8x8xf32>
    %278 = tpu.matmul %275, %277, %cst_89 {dimension_numbers = #tpu.dot_dimension_numbers<[1], [0], [0], [1], [0, 0, 1, 1], [], []>} : vector<8x8xbf16>, vector<8x8xbf16>, vector<8x8xf32> -> vector<8x8xf32>
    %279 = vector.extract_strided_slice %273 {offsets = [8, 0], sizes = [8, 8], strides = [1, 1]} : vector<64x8xf32> to vector<8x8xf32>
    %280 = arith.truncf %279 : vector<8x8xf32> to vector<8x8xbf16>
    %281 = vector.extract_strided_slice %221 {offsets = [0, 72], sizes = [8, 8], strides = [1, 1]} : vector<16x96xf32> to vector<8x8xf32>
    %282 = arith.truncf %281 : vector<8x8xf32> to vector<8x8xbf16>
    %cst_90 = arith.constant dense<0.000000e+00> : vector<8x8xf32>
    %283 = tpu.matmul %280, %282, %cst_90 {dimension_numbers = #tpu.dot_dimension_numbers<[1], [0], [0], [1], [0, 0, 1, 1], [], []>} : vector<8x8xbf16>, vector<8x8xbf16>, vector<8x8xf32> -> vector<8x8xf32>
    %284 = vector.extract_strided_slice %273 {offsets = [16, 0], sizes = [8, 8], strides = [1, 1]} : vector<64x8xf32> to vector<8x8xf32>
    %285 = arith.truncf %284 : vector<8x8xf32> to vector<8x8xbf16>
    %286 = vector.extract_strided_slice %221 {offsets = [0, 80], sizes = [8, 8], strides = [1, 1]} : vector<16x96xf32> to vector<8x8xf32>
    %287 = arith.truncf %286 : vector<8x8xf32> to vector<8x8xbf16>
    %cst_91 = arith.constant dense<0.000000e+00> : vector<8x8xf32>
    %288 = tpu.matmul %285, %287, %cst_91 {dimension_numbers = #tpu.dot_dimension_numbers<[1], [0], [0], [1], [0, 0, 1, 1], [], []>} : vector<8x8xbf16>, vector<8x8xbf16>, vector<8x8xf32> -> vector<8x8xf32>
    %289 = vector.extract_strided_slice %273 {offsets = [24, 0], sizes = [8, 8], strides = [1, 1]} : vector<64x8xf32> to vector<8x8xf32>
    %290 = arith.truncf %289 : vector<8x8xf32> to vector<8x8xbf16>
    %291 = vector.extract_strided_slice %221 {offsets = [0, 88], sizes = [8, 8], strides = [1, 1]} : vector<16x96xf32> to vector<8x8xf32>
    %292 = arith.truncf %291 : vector<8x8xf32> to vector<8x8xbf16>
    %cst_92 = arith.constant dense<0.000000e+00> : vector<8x8xf32>
    %293 = tpu.matmul %290, %292, %cst_92 {dimension_numbers = #tpu.dot_dimension_numbers<[1], [0], [0], [1], [0, 0, 1, 1], [], []>} : vector<8x8xbf16>, vector<8x8xbf16>, vector<8x8xf32> -> vector<8x8xf32>
    %294 = tpu.concatenate %278, %283, %288, %293 in 1 : vector<8x8xf32>, vector<8x8xf32>, vector<8x8xf32>, vector<8x8xf32> -> vector<8x32xf32>
    %295 = vector.extract_strided_slice %273 {offsets = [32, 0], sizes = [8, 8], strides = [1, 1]} : vector<64x8xf32> to vector<8x8xf32>
    %296 = arith.truncf %295 : vector<8x8xf32> to vector<8x8xbf16>
    %297 = vector.extract_strided_slice %221 {offsets = [8, 64], sizes = [8, 8], strides = [1, 1]} : vector<16x96xf32> to vector<8x8xf32>
    %298 = arith.truncf %297 : vector<8x8xf32> to vector<8x8xbf16>
    %cst_93 = arith.constant dense<0.000000e+00> : vector<8x8xf32>
    %299 = tpu.matmul %296, %298, %cst_93 {dimension_numbers = #tpu.dot_dimension_numbers<[1], [0], [0], [1], [0, 0, 1, 1], [], []>} : vector<8x8xbf16>, vector<8x8xbf16>, vector<8x8xf32> -> vector<8x8xf32>
    %300 = vector.extract_strided_slice %273 {offsets = [40, 0], sizes = [8, 8], strides = [1, 1]} : vector<64x8xf32> to vector<8x8xf32>
    %301 = arith.truncf %300 : vector<8x8xf32> to vector<8x8xbf16>
    %302 = vector.extract_strided_slice %221 {offsets = [8, 72], sizes = [8, 8], strides = [1, 1]} : vector<16x96xf32> to vector<8x8xf32>
    %303 = arith.truncf %302 : vector<8x8xf32> to vector<8x8xbf16>
    %cst_94 = arith.constant dense<0.000000e+00> : vector<8x8xf32>
    %304 = tpu.matmul %301, %303, %cst_94 {dimension_numbers = #tpu.dot_dimension_numbers<[1], [0], [0], [1], [0, 0, 1, 1], [], []>} : vector<8x8xbf16>, vector<8x8xbf16>, vector<8x8xf32> -> vector<8x8xf32>
    %305 = vector.extract_strided_slice %273 {offsets = [48, 0], sizes = [8, 8], strides = [1, 1]} : vector<64x8xf32> to vector<8x8xf32>
    %306 = arith.truncf %305 : vector<8x8xf32> to vector<8x8xbf16>
    %307 = vector.extract_strided_slice %221 {offsets = [8, 80], sizes = [8, 8], strides = [1, 1]} : vector<16x96xf32> to vector<8x8xf32>
    %308 = arith.truncf %307 : vector<8x8xf32> to vector<8x8xbf16>
    %cst_95 = arith.constant dense<0.000000e+00> : vector<8x8xf32>
    %309 = tpu.matmul %306, %308, %cst_95 {dimension_numbers = #tpu.dot_dimension_numbers<[1], [0], [0], [1], [0, 0, 1, 1], [], []>} : vector<8x8xbf16>, vector<8x8xbf16>, vector<8x8xf32> -> vector<8x8xf32>
    %310 = vector.extract_strided_slice %273 {offsets = [56, 0], sizes = [8, 8], strides = [1, 1]} : vector<64x8xf32> to vector<8x8xf32>
    %311 = arith.truncf %310 : vector<8x8xf32> to vector<8x8xbf16>
    %312 = vector.extract_strided_slice %221 {offsets = [8, 88], sizes = [8, 8], strides = [1, 1]} : vector<16x96xf32> to vector<8x8xf32>
    %313 = arith.truncf %312 : vector<8x8xf32> to vector<8x8xbf16>
    %cst_96 = arith.constant dense<0.000000e+00> : vector<8x8xf32>
    %314 = tpu.matmul %311, %313, %cst_96 {dimension_numbers = #tpu.dot_dimension_numbers<[1], [0], [0], [1], [0, 0, 1, 1], [], []>} : vector<8x8xbf16>, vector<8x8xbf16>, vector<8x8xf32> -> vector<8x8xf32>
    %315 = tpu.concatenate %299, %304, %309, %314 in 1 : vector<8x8xf32>, vector<8x8xf32>, vector<8x8xf32>, vector<8x8xf32> -> vector<8x32xf32>
    %316 = tpu.concatenate %294, %315 in 0 : vector<8x32xf32>, vector<8x32xf32> -> vector<16x32xf32>
    %317 = arith.truncf %316 : vector<16x32xf32> to vector<16x32xbf16>
    %cst_97 = arith.constant dense<0.000000e+00> : vector<16x32xf32>
    %318 = tpu.matmul %317, %190, %cst_97 {dimension_numbers = #tpu.dot_dimension_numbers<[1], [0], [0], [1], [0, 0, 1, 1], [], []>} : vector<16x32xbf16>, vector<32x32xbf16>, vector<16x32xf32> -> vector<16x32xf32>
    %319 = vector.broadcast %183 : vector<1x32xf32> to vector<16x32xf32>
    %320 = arith.addf %318, %319 : vector<16x32xf32>
    %321 = arith.addf %178, %320 : vector<16x32xf32>
    %cst_98 = arith.constant dense<0.000000e+00> : vector<16xf32>
    %322 = vector.multi_reduction <add>, %321, %cst_98 [1] : vector<16x32xf32> to vector<16xf32>
    %323 = vector.shape_cast %322 : vector<16xf32> to vector<16x1xf32>
    %cst_99 = arith.constant 3.200000e+01 : f32
    %324 = vector.broadcast %cst_99 : f32 to vector<16x1xf32>
    %325 = arith.divf %323, %324 : vector<16x1xf32>
    %326 = vector.broadcast %325 : vector<16x1xf32> to vector<16x32xf32>
    %327 = arith.subf %321, %326 : vector<16x32xf32>
    %328 = arith.mulf %327, %327 : vector<16x32xf32>
    %cst_100 = arith.constant dense<0.000000e+00> : vector<16xf32>
    %329 = vector.multi_reduction <add>, %328, %cst_100 [1] : vector<16x32xf32> to vector<16xf32>
    %330 = vector.shape_cast %329 : vector<16xf32> to vector<16x1xf32>
    %cst_101 = arith.constant 0.0322580636 : f32
    %331 = vector.broadcast %cst_101 : f32 to vector<16x1xf32>
    %332 = arith.mulf %330, %331 : vector<16x1xf32>
    %333 = math.sqrt %332 : vector<16x1xf32>
    %cst_102 = arith.constant 9.99999997E-7 : f32
    %334 = vector.broadcast %cst_102 : f32 to vector<16x1xf32>
    %335 = arith.addf %333, %334 : vector<16x1xf32>
    %336 = tpu.reciprocal %335 {approx = true} : vector<16x1xf32> -> vector<16x1xf32>
    %337 = vector.broadcast %325 : vector<16x1xf32> to vector<16x32xf32>
    %338 = arith.subf %321, %337 : vector<16x32xf32>
    %339 = vector.broadcast %181 : vector<1x32xf32> to vector<16x32xf32>
    %340 = arith.mulf %339, %338 : vector<16x32xf32>
    %341 = vector.broadcast %336 : vector<16x1xf32> to vector<16x32xf32>
    %342 = arith.mulf %340, %341 : vector<16x32xf32>
    %343 = vector.broadcast %182 : vector<1x32xf32> to vector<16x32xf32>
    %344 = arith.addf %342, %343 : vector<16x32xf32>
    %345 = arith.truncf %344 : vector<16x32xf32> to vector<16x32xbf16>
    %cst_103 = arith.constant dense<0.000000e+00> : vector<16x64xf32>
    %346 = tpu.matmul %345, %192, %cst_103 {dimension_numbers = #tpu.dot_dimension_numbers<[1], [0], [0], [1], [0, 0, 1, 1], [], []>} : vector<16x32xbf16>, vector<32x64xbf16>, vector<16x64xf32> -> vector<16x64xf32>
    %347 = vector.broadcast %185 : vector<1x64xf32> to vector<16x64xf32>
    %348 = arith.addf %346, %347 : vector<16x64xf32>
    %cst_104 = arith.constant 0.000000e+00 : f32
    %349 = vector.broadcast %cst_104 : f32 to vector<16x64xf32>
    %350 = arith.maximumf %348, %349 : vector<16x64xf32>
    %351 = arith.truncf %350 : vector<16x64xf32> to vector<16x64xbf16>
    %cst_105 = arith.constant dense<0.000000e+00> : vector<16x32xf32>
    %352 = tpu.matmul %351, %194, %cst_105 {dimension_numbers = #tpu.dot_dimension_numbers<[1], [0], [0], [1], [0, 0, 1, 1], [], []>} : vector<16x64xbf16>, vector<64x32xbf16>, vector<16x32xf32> -> vector<16x32xf32>
    %353 = vector.broadcast %184 : vector<1x32xf32> to vector<16x32xf32>
    %354 = arith.addf %352, %353 : vector<16x32xf32>
    %355 = arith.addf %321, %354 : vector<16x32xf32>
    %c16 = arith.constant 16 : index
    %c0_106 = arith.constant 0 : index
    %356 = vector.load %arg3[%c16, %c0_106] : memref<18x96xf32, #tpu.memory_space<vmem>>, vector<1x32xf32>
    %c17 = arith.constant 17 : index
    %c0_107 = arith.constant 0 : index
    %357 = vector.load %arg3[%c17, %c0_107] : memref<18x96xf32, #tpu.memory_space<vmem>>, vector<1x32xf32>
    %cst_108 = arith.constant dense<0.000000e+00> : vector<16xf32>
    %358 = vector.multi_reduction <add>, %355, %cst_108 [1] : vector<16x32xf32> to vector<16xf32>
    %359 = vector.shape_cast %358 : vector<16xf32> to vector<16x1xf32>
    %cst_109 = arith.constant 3.200000e+01 : f32
    %360 = vector.broadcast %cst_109 : f32 to vector<16x1xf32>
    %361 = arith.divf %359, %360 : vector<16x1xf32>
    %362 = vector.broadcast %361 : vector<16x1xf32> to vector<16x32xf32>
    %363 = arith.subf %355, %362 : vector<16x32xf32>
    %364 = arith.mulf %363, %363 : vector<16x32xf32>
    %cst_110 = arith.constant dense<0.000000e+00> : vector<16xf32>
    %365 = vector.multi_reduction <add>, %364, %cst_110 [1] : vector<16x32xf32> to vector<16xf32>
    %366 = vector.shape_cast %365 : vector<16xf32> to vector<16x1xf32>
    %cst_111 = arith.constant 0.0322580636 : f32
    %367 = vector.broadcast %cst_111 : f32 to vector<16x1xf32>
    %368 = arith.mulf %366, %367 : vector<16x1xf32>
    %369 = math.sqrt %368 : vector<16x1xf32>
    %cst_112 = arith.constant 9.99999997E-7 : f32
    %370 = vector.broadcast %cst_112 : f32 to vector<16x1xf32>
    %371 = arith.addf %369, %370 : vector<16x1xf32>
    %372 = tpu.reciprocal %371 {approx = true} : vector<16x1xf32> -> vector<16x1xf32>
    %373 = vector.broadcast %361 : vector<16x1xf32> to vector<16x32xf32>
    %374 = arith.subf %355, %373 : vector<16x32xf32>
    %375 = vector.broadcast %356 : vector<1x32xf32> to vector<16x32xf32>
    %376 = arith.mulf %375, %374 : vector<16x32xf32>
    %377 = vector.broadcast %372 : vector<16x1xf32> to vector<16x32xf32>
    %378 = arith.mulf %376, %377 : vector<16x32xf32>
    %379 = vector.broadcast %357 : vector<1x32xf32> to vector<16x32xf32>
    %380 = arith.addf %378, %379 : vector<16x32xf32>
    %c0_113 = arith.constant 0 : index
    %c0_114 = arith.constant 0 : index
    %381 = vector.load %arg4[%c0_113, %c0_114] : memref<16x32xf32, #tpu.memory_space<vmem>>, vector<16x32xf32>
    tpu.vector_store %arg4[%c0_113, %c0_114], %380 {strides = array<i32>} : memref<16x32xf32, #tpu.memory_space<vmem>>, vector<16x32xf32>,
    return
  }
}

</mosaic_0001>

<bundles_post_ra>
// kernel: encoder_forward.1
= control target key start
LH: loop header
LB: loop body
LE: loop exit
PB: predicated region body
PF: predicated region fallthrough
CT: control target
= control target key end

     0   :  { %9 = vsyncpa [#allocation3], 0  ;;  %s2564_s0 = inlined_call_operand.vmem [shape: f32[16,32], index: 0, kind: input, shape index: {}]   ;;  %s2565_s1 = inlined_call_operand.vmem [shape: f32[64,8], index: 1, kind: input, shape index: {}]   ;;  %s2566_s2 = inlined_call_operand.hbm [shape: bf16[2,160,96], index: 2, kind: input, shape index: {}]   ;;  %s2567_s3 = inlined_call_operand.vmem [shape: f32[18,96], index: 3, kind: input, shape index: {}]   ;;  %s2568_s4 = inlined_call_operand.hbm [shape: f32[16,32], index: 4, kind: output, shape index: {}]  }
   0x1   :  { %10 = vsyncpa [#allocation4], 0  ;;  %s19_s17 = sshll.u32 %s2566_s2, 4  ;;  %s2039_s18 = smov [#allocation2]   ;;  %s20_s17 = int_to_ptr.hbm [resolvable:$true] %s19_s17 }
   0x2   :  { %s21_s19 = sshll.u32 %s2039_s18, 4  ;;  %s2040_s20 = smov 64   ;;  %s22_s19 = int_to_ptr.vmem [resolvable:$true] %s21_s19 }
   0x3   :  { %s2041_s21 = smov 4  }
   0x4   :  { %27 = dma.hbm_to_vmem [thread:$0]  %s20_s17, 2560, %s22_s19, [#allocation3], %s2040_s20, %s2040_s20, %s2041_s21  }
   0x5   :  { %2035 = dma.done.wait [#allocation3], 2560  }
   0x6   :  { %2036 = vsyncadd [#allocation3], 4294964736  ;;  %vm73_vm0 = vcmask 261120   ;;  %v2091_v0 = vld [vmem:[%s2564_s0] sm:$0xff]  ;;  %v2096_v1 = vld [vmem:[%s2564_s0 + $0x8] sm:$0xff]  ;;  %v2042_v4 = vmov 32.0  }
   0x7   :  { %v74_v2 = vsel %vm73_vm0, %v2091_v0, 0.0  ;;  %v77_v3 = vsel %vm73_vm0, %v2096_v1, 0.0  ;;  %1881 = vrcp.f32 %v2042_v4  ;;  %v1795_v21 = vld [vmem:[#allocation2 + $0x8] sm:$0xff]  ;;  %v1794_v22 = vld [vmem:[#allocation2] sm:$0xff]  ;;  %s2043_s30 = smov 112   ;;  %s2044_s5 = smov 120  }
   0x8   :  { %75 = vadd.xlane.f32.xlu0 %v74_v2  ;;  %160 = vmatpush.bf16.msra.mxu0 %v1795_v21  ;;  %v1863_v49 = vld [vmem:[%s2567_s3] ss:$0 sm:$0xff]  ;;  %v1864_v54 = vld [vmem:[%s2567_s3 + $0x1] ss:$0 sm:$0xff]  ;;  %v1865_v60 = vld [vmem:[%s2567_s3 + $0x7] ss:$0 sm:$0xff] }
   0x9   :  { %s2045_s6 = smov 88   ;;  %s2046_s7 = smov 104   ;;  %vm172_vm6 = vcmask 64512   ;;  %vm455_vm7 = vcmask 1043456   ;;  %vm551_vm8 = vcmask 130048   ;;  %vm553_vm9 = vcmask 195584  }
   0xa   :  { %s2047_s8 = smov 80   ;;  %s2048_s9 = smov 96   ;;  %vm806_vm14 = vcmask 523264  }
   0xb   :  { %s2049_s10 = smov 72   ;;  %s2050_s26 = smov 40  }
   0xc   :  { %161 = vmatpush.bf16.msra.mxu0 %v1794_v22  ;;  %s2051_s27 = smov 56   ;;  %s2053_s28 = smov 8  }
   0xd   :  { %v1882_v5 = vpop.eup %1881  ;;  %s2054_s29 = smov 24   ;;  %s2055_s11 = smov 16  }
   0xe   :  { %v81_v6 = vmul.f32 32.0, %v1882_v5  ;;  %vm85_vm1 = vweird.f32 %v1882_v5  ;;  %s2056_s14 = smov [#allocation5]   ;;  %s1661_s18 = sshll.u32 %s2568_s4, 4  ;;  %s1662_s18 = int_to_ptr.hbm [resolvable:$true] %s1661_s18 }
   0xf   :  { %s1659_s15 = sshll.u32 %s2056_s14, 4  ;;  %s1660_s15 = int_to_ptr.vmem [resolvable:$true] %s1659_s15 }
  0x10   :  { %78 = vadd.xlane.f32.xlu0 %v77_v3  ;;  %v82_v7 = vsub.f32 1.0, %v81_v6 }
  0x12   :  { %v83_v8 = vmul.f32 %v1882_v5, %v82_v7 }
  0x14   :  { %v84_v9 = vadd.f32 %v1882_v5, %v83_v8 }
  0x16   :  { %v2102_v10 = vsel %vm85_vm1, %v1882_v5, %v84_v9 }
  0x7b   :  { %v76_v11 = vpop.xlane.xlu0 %75 }
  0x7c   :  { %v87_v12 = vmul.f32 %v2102_v10, %v76_v11 }
  0x7e   :  { %v89_v13 = vsub.f32 %v2091_v0, %v87_v12 }
  0x80   :  { %v91_v14 = vmul.f32 %v89_v13, %v89_v13  ;;  %v130_v51 = vmul.f32 %v1863_v49, %v89_v13 }
  0x82   :  { %v93_v15 = vsel %vm73_vm0, %v91_v14, 0.0 }
  0x83   :  { %94 = vadd.xlane.f32.xlu1 %v93_v15  ;;  %v79_v16 = vpop.xlane.xlu0 %78 }
  0x84   :  { %v88_v17 = vmul.f32 %v2102_v10, %v79_v16 }
  0x86   :  { %v90_v18 = vsub.f32 %v2096_v1, %v88_v17 }
  0x88   :  { %v92_v19 = vmul.f32 %v90_v18, %v90_v18  ;;  %v131_v52 = vmul.f32 %v1863_v49, %v90_v18 }
  0x8a   :  { %v96_v20 = vsel %vm73_vm0, %v92_v19, 0.0 }
  0x8b   :  { %97 = vadd.xlane.f32.xlu1 %v96_v20 }
  0xf6   :  { %v95_v23 = vpop.xlane.xlu1 %94 }
  0xf7   :  { %v99_v24 = vmul.f32 0.032258064, %v95_v23 }
  0xf9   :  { %1883 = vrsqrt.f32 %v99_v24  ;;  %vm108_vm2 = vcmp.eq.f32.partialorder %v99_v24, inf  ;;  %v111_v37 = vand.u32 2147483648, %v99_v24  ;;  %vm110_vm3 = vcmp.eq.f32.partialorder %v99_v24, 0.0 }
  0xfe   :  { %v98_v25 = vpop.xlane.xlu1 %97 }
  0xff   :  { %v1884_v26 = vpop.eup %1883  ;;  %v100_v27 = vmul.f32 0.032258064, %v98_v25 }
 0x100   :  { %v102_v28 = vmul.f32 %v1884_v26, %v99_v24 }
 0x101   :  { %1885 = vrsqrt.f32 %v100_v27  ;;  %vm120_vm4 = vcmp.eq.f32.partialorder %v100_v27, inf  ;;  %v123_v45 = vand.u32 2147483648, %v100_v27  ;;  %vm122_vm5 = vcmp.eq.f32.partialorder %v100_v27, 0.0 }
 0x102   :  { %v103_v29 = vmul.f32 %v1884_v26, %v102_v28  ;;  %v2173_v28 = vld [vmem:[%s2565_s1 + $0x10] sm:$0xff] }
 0x104   :  { %v104_v30 = vmul.f32 0.5, %v103_v29 }
 0x106   :  { %v105_v31 = vsub.f32 1.5, %v104_v30 }
 0x107   :  { %v1886_v32 = vpop.eup %1885 }
 0x108   :  { %v114_v33 = vmul.f32 %v1886_v32, %v100_v27  ;;  %v106_v34 = vmul.f32 %v1884_v26, %v105_v31  ;;  %v2178_v31 = vld [vmem:[%s2565_s1 + $0x18] sm:$0xff] }
 0x10a   :  { %v115_v35 = vmul.f32 %v1886_v32, %v114_v33  ;;  %v107_v36 = vmul.f32 %v106_v34, %v99_v24 }
 0x10c   :  { %v109_v38 = vsel %vm108_vm2, %v99_v24, %v107_v36  ;;  %v116_v39 = vmul.f32 0.5, %v115_v35 }
 0x10d   :  { %v112_v40 = vsel %vm110_vm3, %v111_v37, %v109_v38 }
 0x10e   :  { %v117_v41 = vsub.f32 1.5, %v116_v39  ;;  %v125_v43 = vadd.f32 1e-06, %v112_v40  ;;  %v2187_v40 = vld [vmem:[%s2565_s1 + $0x30] sm:$0xff] }
 0x110   :  { %v118_v42 = vmul.f32 %v1886_v32, %v117_v41  ;;  %1887 = vrcp.f32 %v125_v43  ;;  %v2192_v43 = vld [vmem:[%s2565_s1] sm:$0xff] }
 0x112   :  { %v119_v44 = vmul.f32 %v118_v42, %v100_v27 }
 0x114   :  { %v121_v46 = vsel %vm120_vm4, %v100_v27, %v119_v44  ;;  %v2197_v44 = vld [vmem:[%s2565_s1 + $0x38] sm:$0xff] }
 0x115   :  { %v124_v47 = vsel %vm122_vm5, %v123_v45, %v121_v46 }
 0x116   :  { %v126_v48 = vadd.f32 1e-06, %v124_v47  ;;  %v1888_v50 = vpop.eup %1887 }
 0x117   :  { %v132_v53 = vmul.f32 %v1888_v50, %v130_v51 }
 0x118   :  { %1889 = vrcp.f32 %v126_v48 }
 0x119   :  { %v135_v57 = vadd.f32 %v1864_v54, %v132_v53  ;;  %v2217_v53 = vld [vmem:[%s2565_s1 + $0x8] sm:$0xff] }
 0x11e   :  { %v1890_v55 = vpop.eup %1889 }
 0x11f   :  { %v133_v56 = vmul.f32 %v1890_v55, %v131_v52 }
 0x121   :  { %v136_v58 = vadd.f32 %v1864_v54, %v133_v56 }
 0x123   :  { %v137_v59 = vpack.c.bf16 %v136_v58, %v135_v57 }
 0x125   :  { %1682 = vmatmul.msk.bf16.vlgmr.msra.gmra.mxu0 %vm73_vm0, %v137_v59 }
 0x1a2   :  { %v163_v61 = vpop.f32.mrf.mxu0 }
 0x1a3   :  { %v164_v62 = vadd.f32 %v1865_v60, %v163_v61  ;;  %v2229_v61 = vld [vmem:[%s2565_s1 + $0x20] sm:$0xff] }
 0x1a5   :  { %v2120_v63 = vpack.c.bf16 %v164_v62, %v164_v62 }
 0x1a7   :  { %215 = vrot.lane.b32.xlu1 %v2120_v63, %s2043_s30  ;;  %192 = vrot.lane.b32.xlu0 %v2120_v63, %s2044_s5 }
 0x1a8   :  { %194 = vrot.lane.b32.xlu2 %v2120_v63, %s2045_s6 }
 0x1aa   :  { %v165_v2 = vpop.f32.mrf.mxu0 }
 0x1ab   :  { %v166_v3 = vadd.f32 %v1865_v60, %v165_v2  ;;  %v2224_v60 = vld [vmem:[%s2565_s1 + $0x28] sm:$0xff]  ;;  %s2052_s1 = smov 48  }
 0x1ad   :  { %v2128_v4 = vpack.c.bf16 %v166_v3, %v166_v3 }
 0x1af   :  { %307 = vrot.lane.b32.xlu1 %v2128_v4, %s2043_s30  ;;  %238 = vrot.lane.b32.xlu0 %v2120_v63, %s2046_s7 }
 0x1b0   :  { %217 = vrot.lane.b32.xlu2 %v2120_v63, %s2047_s8 }
 0x1b7   :  { %170 = vrot.lane.b32.xlu1 %v2120_v63, %s2048_s9  ;;  %332 = vrot.lane.b32.xlu0 %v2128_v4, %s2049_s10 }
 0x1b8   :  { %240 = vrot.lane.b32.xlu2 %v2120_v63, %s2049_s10 }
 0x1bf   :  { %263 = vrot.lane.b32.xlu0 %v2128_v4, %s2048_s9 }
 0x1c0   :  { %286 = vrot.lane.b32.xlu2 %v2128_v4, %s2045_s6 }
 0x1c8   :  { %309 = vrot.lane.b32.xlu2 %v2128_v4, %s2047_s8 }
 0x1d0   :  { %284 = vrot.lane.b32.xlu2 %v2128_v4, %s2044_s5 }
 0x1d8   :  { %330 = vrot.lane.b32.xlu2 %v2128_v4, %s2046_s7 }
 0x202   :  { %v195_v5 = vpop.permute.xlu2 %194 }
 0x203   :  { %v200_v6 = vsel %vm172_vm6, %v195_v5, 0 }
 0x204   :  { %209 = vmatpush.bf16.xpose.msra.mxu2 %v200_v6 }
 0x20a   :  { %v218_v7 = vpop.permute.xlu2 %217 }
 0x20b   :  { %v223_v8 = vsel %vm172_vm6, %v218_v7, 0 }
 0x20c   :  { %232 = vmatpush.bf16.xpose.msra.mxu3 %v223_v8 }
 0x212   :  { %v241_v9 = vpop.permute.xlu2 %240 }
 0x213   :  { %v246_v11 = vsel %vm172_vm6, %v241_v9, 0 }
 0x214   :  { %255 = vmatpush.bf16.xpose.msrb.mxu0 %v246_v11 }
 0x219   :  { %v216_v12 = vpop.permute.xlu1 %215  ;;  %v193_v13 = vpop.permute.xlu0 %192 }
 0x21a   :  { %v287_v14 = vpop.permute.xlu2 %286  ;;  %1684 = vmatmul.msk.bf16.vlgmr.msra.gmra.mxu2 %vm172_vm6, %v193_v13  ;;  %1685 = vmatmul.msk.bf16.vlgmr.msra.gmra.mxu3 %vm172_vm6, %v216_v12 }
 0x21b   :  { %v292_v15 = vsel %vm172_vm6, %v287_v14, 0 }
 0x21c   :  { %301 = vmatpush.bf16.xpose.msrb.mxu2 %v292_v15 }
 0x221   :  { %v308_v16 = vpop.permute.xlu1 %307  ;;  %v239_v17 = vpop.permute.xlu0 %238 }
 0x222   :  { %v310_v18 = vpop.permute.xlu2 %309  ;;  %1686 = vmatmul.msk.bf16.vlgmr.msrb.gmra.mxu0 %vm172_vm6, %v239_v17 }
 0x223   :  { %v315_v19 = vsel %vm172_vm6, %v310_v18, 0 }
 0x224   :  { %324 = vmatpush.bf16.xpose.msrb.mxu3 %v315_v19 }
 0x229   :  { %v171_v20 = vpop.permute.xlu1 %170  ;;  %v333_v21 = vpop.permute.xlu0 %332 }
 0x22a   :  { %v338_v22 = vsel %vm172_vm6, %v333_v21, 0  ;;  %v285_v23 = vpop.permute.xlu2 %284  ;;  %v177_v24 = vsel %vm172_vm6, %v171_v20, 0 }
 0x22b   :  { %1688 = vmatmul.msk.bf16.vlgmr.msrb.gmra.mxu2 %vm172_vm6, %v285_v23  ;;  %1689 = vmatmul.msk.bf16.vlgmr.msrb.gmra.mxu3 %vm172_vm6, %v308_v16 }
 0x22c   :  { %186 = vmatpush.bf16.xpose.msra.mxu1 %v177_v24  ;;  %347 = vmatpush.bf16.xpose.msra.mxu0 %v338_v22 }
 0x231   :  { %v264_v25 = vpop.permute.xlu0 %263 }
 0x232   :  { %v331_v26 = vpop.permute.xlu2 %330  ;;  %v269_v27 = vsel %vm172_vm6, %v264_v25, 0 }
 0x233   :  { %1683 = vmatmul.msk.bf16.vlgmr.msra.gmra.mxu1 %vm172_vm6, %v2120_v63  ;;  %1690 = vmatmul.msk.bf16.vlgmr.msra.gmra.mxu0 %vm172_vm6, %v331_v26 }
 0x234   :  { %278 = vmatpush.bf16.xpose.msrb.mxu1 %v269_v27 }
 0x243   :  { %1687 = vmatmul.msk.bf16.vlgmr.msrb.gmra.mxu1 %vm172_vm6, %v2128_v4 }
 0x29d   :  { %v211_v29 = vpop.f32.mrf.mxu2  ;;  %v234_v30 = vpop.f32.mrf.mxu3 }
 0x29e   :  { %v355_v32 = vadd.f32 %v234_v30, %v2173_v28  ;;  %v354_v56 = vadd.f32 %v211_v29, %v2217_v53 }
 0x29f   :  { %v257_v33 = vpop.f32.mrf.mxu0 }
 0x2a0   :  { %v356_v34 = vadd.f32 %v257_v33, %v2178_v31  ;;  %v367_v35 = vsel %vm172_vm6, %v355_v32, -inf  ;;  %v364_v59 = vsel %vm172_vm6, %v354_v56, -inf }
 0x2a1   :  { %368 = vmax.xlane.f32.xlu1 %v367_v35 }
 0x2a2   :  { %v370_v36 = vsel %vm172_vm6, %v356_v34, -inf }
 0x2a3   :  { %371 = vmax.xlane.f32.xlu0 %v370_v36 }
 0x2a5   :  { %v213_v37 = vpop.f32.mrf.mxu2  ;;  %v236_v38 = vpop.f32.mrf.mxu3 }
 0x2a7   :  { %v259_v39 = vpop.f32.mrf.mxu0 }
 0x2ae   :  { %v303_v41 = vpop.f32.mrf.mxu2  ;;  %v326_v42 = vpop.f32.mrf.mxu3 }
 0x2af   :  { %v2200_v45 = vadd.f32 %v326_v42, %v2187_v40  ;;  %v358_v62 = vadd.f32 %v303_v41, %v2224_v60 }
 0x2b0   :  { %v188_v46 = vpop.f32.mrf.mxu1  ;;  %v349_v47 = vpop.f32.mrf.mxu0 }
 0x2b1   :  { %v2203_v48 = vadd.f32 %v188_v46, %v2192_v43  ;;  %v2206_v49 = vadd.f32 %v349_v47, %v2197_v44  ;;  %v379_v50 = vsel %vm172_vm6, %v2200_v45, -inf  ;;  %v376_v5 = vsel %vm172_vm6, %v358_v62, -inf }
 0x2b2   :  { %380 = vmax.xlane.f32.xlu1 %v379_v50 }
 0x2b3   :  { %v361_v51 = vsel %vm172_vm6, %v2203_v48, -inf  ;;  %v382_v52 = vsel %vm172_vm6, %v2206_v49, -inf }
 0x2b4   :  { %362 = vmax.xlane.f32.xlu2 %v361_v51  ;;  %383 = vmax.xlane.f32.xlu0 %v382_v52 }
 0x2b6   :  { %v305_v54 = vpop.f32.mrf.mxu2  ;;  %v328_v55 = vpop.f32.mrf.mxu3 }
 0x2b8   :  { %v190_v57 = vpop.f32.mrf.mxu1  ;;  %v351_v58 = vpop.f32.mrf.mxu0 }
 0x2bc   :  { %365 = vmax.xlane.f32.xlu2 %v364_v59 }
 0x2c0   :  { %v280_v2 = vpop.f32.mrf.mxu1 }
 0x2c1   :  { %v357_v3 = vadd.f32 %v280_v2, %v2229_v61 }
 0x2c3   :  { %v373_v6 = vsel %vm172_vm6, %v357_v3, -inf }
 0x2c4   :  { %377 = vmax.xlane.f32.xlu2 %v376_v5  ;;  %374 = vmax.xlane.f32.xlu0 %v373_v6 }
 0x2c8   :  { %v282_v7 = vpop.f32.mrf.mxu1 }
 0x2d8   :  { %517 = vrot.lane.b32.xlu0 %v2120_v63, %s2050_s26 }
 0x2e0   :  { %578 = vrot.lane.b32.xlu0 %v2128_v4, %s2051_s27 }
 0x2e8   :  { %600 = vrot.lane.b32.xlu0 %v2128_v4, %s2052_s1 }
 0x314   :  { %v369_v8 = vpop.xlane.xlu1 %368 }
 0x315   :  { %v387_v9 = vsub.f32 %v355_v32, %v369_v8 }
 0x316   :  { %v372_v11 = vpop.xlane.xlu0 %371 }
 0x317   :  { %v397_v12 = vmul.f32 1.442695, %v387_v9  ;;  %v388_v13 = vsub.f32 %v356_v34, %v372_v11 }
 0x319   :  { %1891 = vpow2.f32 %v397_v12  ;;  %v399_v14 = vmul.f32 1.442695, %v388_v13 }
 0x31b   :  { %1893 = vpow2.f32 %v399_v14 }
 0x31f   :  { %v2241_v15 = vpop.eup %1891 }
 0x320   :  { %v415_v16 = vsel %vm172_vm6, %v2241_v15, 0.0 }
 0x321   :  { %v2245_v17 = vpop.eup %1893  ;;  %416 = vadd.xlane.f32.xlu0 %v415_v16 }
 0x322   :  { %v418_v18 = vsel %vm172_vm6, %v2245_v17, 0.0 }
 0x323   :  { %419 = vadd.xlane.f32.xlu2 %v418_v18 }
 0x325   :  { %v381_v47 = vpop.xlane.xlu1 %380 }
 0x326   :  { %v391_v50 = vsub.f32 %v2200_v45, %v381_v47 }
 0x327   :  { %v363_v19 = vpop.xlane.xlu2 %362  ;;  %v384_v26 = vpop.xlane.xlu0 %383 }
 0x328   :  { %v392_v36 = vsub.f32 %v2206_v49, %v384_v26  ;;  %v405_v51 = vmul.f32 1.442695, %v391_v50  ;;  %v385_v52 = vsub.f32 %v2203_v48, %v363_v19 }
 0x32a   :  { %v407_v37 = vmul.f32 1.442695, %v392_v36  ;;  %v393_v54 = vmul.f32 1.442695, %v385_v52 }
 0x32f   :  { %v366_v20 = vpop.xlane.xlu2 %365 }
 0x330   :  { %v386_v21 = vsub.f32 %v354_v56, %v366_v20 }
 0x332   :  { %v395_v22 = vmul.f32 1.442695, %v386_v21 }
 0x334   :  { %1895 = vpow2.f32 %v395_v22 }
 0x337   :  { %v378_v23 = vpop.xlane.xlu2 %377  ;;  %v375_v30 = vpop.xlane.xlu0 %374 }
 0x338   :  { %v390_v24 = vsub.f32 %v358_v62, %v378_v23  ;;  %v389_v38 = vsub.f32 %v357_v3, %v375_v30 }
 0x33a   :  { %v2249_v25 = vpop.eup %1895  ;;  %v403_v27 = vmul.f32 1.442695, %v390_v24  ;;  %v401_v39 = vmul.f32 1.442695, %v389_v38 }
 0x33b   :  { %495 = vrot.lane.b32.xlu2 %v2120_v63, %s2052_s1  ;;  %v412_v29 = vsel %vm172_vm6, %v2249_v25, 0.0 }
 0x33c   :  { %413 = vadd.xlane.f32.xlu1 %v412_v29  ;;  %1897 = vpow2.f32 %v403_v27 }
 0x33d   :  { %1899 = vpow2.f32 %v407_v37 }
 0x33e   :  { %1901 = vpow2.f32 %v401_v39 }
 0x33f   :  { %1903 = vpow2.f32 %v405_v51 }
 0x340   :  { %1905 = vpow2.f32 %v393_v54 }
 0x342   :  { %v2255_v32 = vpop.eup %1897 }
 0x343   :  { %v424_v33 = vsel %vm172_vm6, %v2255_v32, 0.0  ;;  %v2265_v41 = vpop.eup %1899 }
 0x344   :  { %425 = vadd.xlane.f32.xlu0 %v424_v33  ;;  %v430_v42 = vsel %vm172_vm6, %v2265_v41, 0.0  ;;  %v2269_v46 = vpop.eup %1901 }
 0x345   :  { %v421_v49 = vsel %vm172_vm6, %v2269_v46, 0.0  ;;  %v1904_v55 = vpop.eup %1903 }
 0x346   :  { %v427_v56 = vsel %vm172_vm6, %v1904_v55, 0.0  ;;  %v1906_v57 = vpop.eup %1905 }
 0x347   :  { %v409_v59 = vsel %vm172_vm6, %v1906_v57, 0.0 }
 0x34a   :  { %v518_v34 = vpop.permute.xlu0 %517 }
 0x34b   :  { %v523_v35 = vsel %vm455_vm7, %v518_v34, 0 }
 0x34c   :  { %532 = vmatpush.bf16.msrb.mxu0 %v523_v35 }
 0x352   :  { %v579_v58 = vpop.permute.xlu0 %578 }
 0x355   :  { %473 = vrot.lane.b32.xlu1 %v2120_v63, %s2051_s27 }
 0x358   :  { %622 = vrot.lane.b32.xlu0 %v2128_v4, %s2050_s26 }
 0x35a   :  { %v601_v62 = vpop.permute.xlu0 %600 }
 0x35b   :  { %v606_v9 = vsel %vm455_vm7, %v601_v62, 0 }
 0x364   :  { %431 = vadd.xlane.f32.xlu2 %v430_v42 }
 0x36c   :  { %422 = vadd.xlane.f32.xlu2 %v421_v49 }
 0x37f   :  { %428 = vadd.xlane.f32.xlu1 %v427_v56 }
 0x382   :  { %410 = vadd.xlane.f32.xlu0 %v409_v59 }
 0x384   :  { %556 = vrot.lane.b32.xlu2 %v2128_v4, %s2040_s20 }
 0x394   :  { %v417_v45 = vpop.xlane.xlu0 %416 }
 0x395   :  { %1907 = vrcp.f32 %v417_v45 }
 0x396   :  { %v420_v2 = vpop.xlane.xlu2 %419 }
 0x397   :  { %1909 = vrcp.f32 %v420_v2 }
 0x398   :  { %450 = vrot.lane.b32.xlu1 %v2120_v63, %s2040_s20 }
 0x39b   :  { %v1908_v48 = vpop.eup %1907 }
 0x39c   :  { %v443_v5 = vmul.f32 %v1908_v48, %v2241_v15 }
 0x39d   :  { %v1910_v3 = vpop.eup %1909 }
 0x39e   :  { %v444_v6 = vmul.f32 %v1910_v3, %v2245_v17  ;;  %v496_v7 = vpop.permute.xlu2 %495  ;;  %v494_v11 = vpack.c.bf16 %v443_v5, %v443_v5  ;;  %v584_v17 = vsel %vm455_vm7, %v579_v58, 0 }
 0x39f   :  { %v501_v8 = vsel %vm455_vm7, %v496_v7, 0 }
 0x3a0   :  { %v516_v4 = vpack.c.bf16 %v444_v6, %v444_v6  ;;  %510 = vmatpush.bf16.msra.mxu3 %v501_v8 }
 0x3a2   :  { %1694 = vmatmul.msk.bf16.vlgmr.msrb.gmra.mxu0 %vm172_vm6, %v516_v4 }
 0x3a3   :  { %1693 = vmatmul.msk.bf16.vlgmr.msra.gmra.mxu3 %vm172_vm6, %v494_v11  ;;  %v1797_v11 = vld [vmem:[#allocation2 + $0x18] sm:$0xff] }
 0x3a4   :  { %615 = vmatpush.bf16.msrb.mxu3 %v606_v9 }
 0x3af   :  { %v414_v63 = vpop.xlane.xlu1 %413 }
 0x3b0   :  { %1911 = vrcp.f32 %v414_v63  ;;  %v1796_v63 = vld [vmem:[#allocation2 + $0x10] sm:$0xff] }
 0x3b6   :  { %v1912_v12 = vpop.eup %1911 }
 0x3b7   :  { %v426_v13 = vpop.xlane.xlu0 %425  ;;  %v442_v14 = vmul.f32 %v1912_v12, %v2249_v25 }
 0x3b8   :  { %1913 = vrcp.f32 %v426_v13 }
 0x3b9   :  { %v472_v18 = vpack.c.bf16 %v442_v14, %v442_v14 }
 0x3be   :  { %v1914_v21 = vpop.eup %1913 }
 0x3bf   :  { %v446_v22 = vmul.f32 %v1914_v21, %v2255_v32 }
 0x3c1   :  { %v577_v24 = vpack.c.bf16 %v446_v22, %v446_v22 }
 0x3c7   :  { %v474_v15 = vpop.permute.xlu1 %473 }
 0x3c8   :  { %v479_v16 = vsel %vm455_vm7, %v474_v15, 0 }
 0x3c9   :  { %488 = vmatpush.bf16.msra.mxu2 %v479_v16 }
 0x3ca   :  { %v623_v19 = vpop.permute.xlu0 %622 }
 0x3cb   :  { %v628_v20 = vsel %vm455_vm7, %v623_v19, 0 }
 0x3cc   :  { %1692 = vmatmul.msk.bf16.vlgmr.msra.gmra.mxu2 %vm172_vm6, %v472_v18  ;;  %637 = vmatpush.bf16.msra.mxu0 %v628_v20 }
 0x3cd   :  { %593 = vmatpush.bf16.msrb.mxu2 %v584_v17 }
 0x3d7   :  { %v432_v23 = vpop.xlane.xlu2 %431 }
 0x3d8   :  { %1915 = vrcp.f32 %v432_v23 }
 0x3dc   :  { %1696 = vmatmul.msk.bf16.vlgmr.msrb.gmra.mxu2 %vm172_vm6, %v577_v24 }
 0x3de   :  { %v1916_v25 = vpop.eup %1915 }
 0x3df   :  { %v448_v26 = vmul.f32 %v1916_v25, %v2265_v41  ;;  %v423_v32 = vpop.xlane.xlu2 %422 }
 0x3e1   :  { %v621_v27 = vpack.c.bf16 %v448_v26, %v448_v26 }
 0x3e3   :  { %1698 = vmatmul.msk.bf16.vlgmr.msra.gmra.mxu0 %vm172_vm6, %v621_v27 }
 0x3e7   :  { %v557_v37 = vpop.permute.xlu2 %556 }
 0x3e8   :  { %v562_v41 = vsel %vm455_vm7, %v557_v37, 0 }
 0x3f2   :  { %v429_v29 = vpop.xlane.xlu1 %428 }
 0x3f3   :  { %1917 = vrcp.f32 %v429_v29  ;;  %v1866_v29 = vld [vmem:[%s2567_s3 + $0x4] ss:$0 sm:$0xff] }
 0x3f5   :  { %v411_v35 = vpop.xlane.xlu0 %410 }
 0x3f6   :  { %1919 = vrcp.f32 %v411_v35 }
 0x3f7   :  { %1921 = vrcp.f32 %v423_v32 }
 0x3f9   :  { %v1918_v30 = vpop.eup %1917 }
 0x3fa   :  { %v447_v33 = vmul.f32 %v1918_v30, %v1904_v55 }
 0x3fc   :  { %v599_v34 = vpack.c.bf16 %v447_v33, %v447_v33  ;;  %v1920_v36 = vpop.eup %1919 }
 0x3fd   :  { %v441_v38 = vmul.f32 %v1920_v36, %v1906_v57  ;;  %v1922_v49 = vpop.eup %1921 }
 0x3fe   :  { %1697 = vmatmul.msk.bf16.vlgmr.msrb.gmra.mxu3 %vm172_vm6, %v599_v34  ;;  %v445_v50 = vmul.f32 %v1922_v49, %v2269_v46 }
 0x3ff   :  { %v449_v47 = vpack.c.bf16 %v441_v38, %v441_v38 }
 0x400   :  { %v555_v51 = vpack.c.bf16 %v445_v50, %v445_v50 }
 0x40a   :  { %v451_v39 = vpop.permute.xlu1 %450 }
 0x40b   :  { %v457_v42 = vsel %vm455_vm7, %v451_v39, 0 }
 0x40c   :  { %466 = vmatpush.bf16.msra.mxu1 %v457_v42 }
 0x40f   :  { %1691 = vmatmul.msk.bf16.vlgmr.msra.gmra.mxu1 %vm172_vm6, %v449_v47 }
 0x410   :  { %571 = vmatpush.bf16.msrb.mxu1 %v562_v41 }
 0x414   :  { %681 = vmatpush.bf16.msra.mxu1 %v1797_v11 }
 0x418   :  { %682 = vmatpush.bf16.msra.mxu1 %v1796_v63 }
 0x41f   :  { %1695 = vmatmul.msk.bf16.vlgmr.msrb.gmra.mxu1 %vm172_vm6, %v555_v51  ;;  %v534_v52 = vpop.f32.mrf.mxu0 }
 0x426   :  { %v512_v54 = vpop.f32.mrf.mxu3 }
 0x427   :  { %v536_v55 = vpop.f32.mrf.mxu0 }
 0x42e   :  { %v514_v56 = vpop.f32.mrf.mxu3 }
 0x42f   :  { %v1798_v56 = vld [vmem:[#allocation2 + $0x20] sm:$0xff] }
 0x44f   :  { %v490_v57 = vpop.f32.mrf.mxu2 }
 0x457   :  { %v492_v58 = vpop.f32.mrf.mxu2 }
 0x45f   :  { %v595_v59 = vpop.f32.mrf.mxu2 }
 0x460   :  { %v1833_v62 = vpack.i.bf16 %v595_v59, %v490_v57  ;;  %v639_v45 = vpop.f32.mrf.mxu0 }
 0x461   :  { %v1843_v2 = vpack.i.bf16 %v639_v45, %v534_v52 }
 0x462   :  { %1834 = vrot.lane.b32.xlu1 %v1833_v62, %s2053_s28 }
 0x463   :  { %1844 = vrot.lane.b32.xlu2 %v1843_v2, %s2054_s29 }
 0x467   :  { %v597_v46 = vpop.f32.mrf.mxu2 }
 0x468   :  { %v641_v48 = vpop.f32.mrf.mxu0 }
 0x481   :  { %v617_v3 = vpop.f32.mrf.mxu3 }
 0x482   :  { %v1838_v5 = vpack.i.bf16 %v617_v3, %v512_v54  ;;  %v1799_v54 = vld [vmem:[#allocation2 + $0x28] sm:$0xff] }
 0x483   :  { %770 = vmatpush.bf16.msra.mxu2 %v1799_v54 }
 0x484   :  { %1839 = vrot.lane.b32.xlu1 %v1838_v5, %s2055_s11 }
 0x487   :  { %771 = vmatpush.bf16.msra.mxu2 %v1798_v56 }
 0x489   :  { %v619_v6 = vpop.f32.mrf.mxu3 }
 0x48c   :  { %v468_v7 = vpop.f32.mrf.mxu1 }
 0x494   :  { %v470_v8 = vpop.f32.mrf.mxu1 }
 0x49c   :  { %v573_v9 = vpop.f32.mrf.mxu1 }
 0x4a4   :  { %v575_v4 = vpop.f32.mrf.mxu1 }
 0x4bd   :  { %v1845_v15 = vpop.permute.xlu2 %1844 }
 0x4be   :  { %v1847_v19 = vunpack.i.h.bf16 %v1845_v15  ;;  %v1846_v20 = vunpack.i.l.bf16 %v1845_v15 }
 0x4d4   :  { %v1835_v12 = vpop.permute.xlu1 %1834 }
 0x4d5   :  { %v1837_v13 = vunpack.i.h.bf16 %v1835_v12  ;;  %v1836_v14 = vunpack.i.l.bf16 %v1835_v12 }
 0x4d7   :  { %v550_v21 = vsel %vm172_vm6, %v468_v7, %v1836_v14  ;;  %v655_v22 = vsel %vm172_vm6, %v573_v9, %v1837_v13 }
 0x4f6   :  { %v1840_v16 = vpop.permute.xlu1 %1839 }
 0x4f7   :  { %v1842_v17 = vunpack.i.h.bf16 %v1840_v16  ;;  %v1841_v18 = vunpack.i.l.bf16 %v1840_v16 }
 0x4f9   :  { %v552_v23 = vsel %vm551_vm8, %v550_v21, %v1841_v18  ;;  %v656_v24 = vsel %vm551_vm8, %v655_v22, %v1842_v17 }
 0x4fa   :  { %v554_v25 = vsel %vm553_vm9, %v552_v23, %v1846_v20  ;;  %v657_v26 = vsel %vm553_vm9, %v656_v24, %v1847_v19  ;;  %v1867_v20 = vld [vmem:[%s2567_s3 + $0x2] ss:$0 sm:$0xff] }
 0x4fb   :  { %v658_v27 = vpack.c.bf16 %v657_v26, %v554_v25  ;;  %v1868_v25 = vld [vmem:[%s2567_s3 + $0x3] ss:$0 sm:$0xff] }
 0x4fd   :  { %1707 = vmatmul.msk.bf16.vlgmr.msra.gmra.mxu1 %vm73_vm0, %v658_v27 }
 0x57a   :  { %v684_v30 = vpop.f32.mrf.mxu1 }
 0x57b   :  { %v685_v33 = vadd.f32 %v1866_v29, %v684_v30 }
 0x57d   :  { %v2316_v34 = vadd.f32 %v685_v33, %v2091_v0 }
 0x57f   :  { %v691_v35 = vsel %vm73_vm0, %v2316_v34, 0.0 }
 0x580   :  { %692 = vadd.xlane.f32.xlu0 %v691_v35  ;;  %v1803_v35 = vld [vmem:[#allocation2 + $0x48] sm:$0xff] }
 0x581   :  { %814 = vmatpush.bf16.msra.mxu3 %v1803_v35 }
 0x582   :  { %v686_v32 = vpop.f32.mrf.mxu1 }
 0x583   :  { %v687_v36 = vadd.f32 %v1866_v29, %v686_v32  ;;  %v1802_v32 = vld [vmem:[#allocation2 + $0x40] sm:$0xff] }
 0x585   :  { %v2321_v37 = vadd.f32 %v687_v36, %v2096_v1  ;;  %815 = vmatpush.bf16.msra.mxu3 %v1802_v32  ;;  %v1801_v36 = vld [vmem:[#allocation2 + $0x38] sm:$0xff] }
 0x587   :  { %v694_v38 = vsel %vm73_vm0, %v2321_v37, 0.0 }
 0x588   :  { %695 = vadd.xlane.f32.xlu1 %v694_v38  ;;  %v1800_v38 = vld [vmem:[#allocation2 + $0x30] sm:$0xff] }
 0x589   :  { %816 = vmatpush.bf16.msra.mxu3 %v1801_v36 }
 0x58d   :  { %817 = vmatpush.bf16.msra.mxu3 %v1800_v38 }
 0x5f3   :  { %v693_v39 = vpop.xlane.xlu0 %692 }
 0x5f4   :  { %v697_v42 = vmul.f32 %v693_v39, %v2102_v10 }
 0x5f6   :  { %v699_v41 = vsub.f32 %v2316_v34, %v697_v42  ;;  %v1869_v42 = vld [vmem:[%s2567_s3 + $0x6] ss:$0 sm:$0xff] }
 0x5f8   :  { %v701_v0 = vmul.f32 %v699_v41, %v699_v41  ;;  %v740_v22 = vmul.f32 %v1867_v20, %v699_v41 }
 0x5fa   :  { %v703_v47 = vsel %vm73_vm0, %v701_v0, 0.0 }
 0x5fb   :  { %v696_v49 = vpop.xlane.xlu1 %695  ;;  %704 = vadd.xlane.f32.xlu2 %v703_v47 }
 0x5fc   :  { %v698_v50 = vmul.f32 %v696_v49, %v2102_v10 }
 0x5fe   :  { %v700_v51 = vsub.f32 %v2321_v37, %v698_v50 }
 0x600   :  { %v702_v1 = vmul.f32 %v700_v51, %v700_v51  ;;  %v741_v23 = vmul.f32 %v1867_v20, %v700_v51 }
 0x602   :  { %v706_v52 = vsel %vm73_vm0, %v702_v1, 0.0  ;;  %v1870_v1 = vld [vmem:[%s2567_s3 + $0x5] ss:$0 sm:$0xff] }
 0x603   :  { %707 = vadd.xlane.f32.xlu0 %v706_v52 }
 0x66e   :  { %v705_v55 = vpop.xlane.xlu2 %704 }
 0x66f   :  { %v709_v57 = vmul.f32 0.032258064, %v705_v55 }
 0x671   :  { %1923 = vrsqrt.f32 %v709_v57  ;;  %vm718_vm10 = vcmp.eq.f32.partialorder %v709_v57, inf  ;;  %v721_v9 = vand.u32 2147483648, %v709_v57  ;;  %vm720_vm11 = vcmp.eq.f32.partialorder %v709_v57, 0.0 }
 0x676   :  { %v708_v58 = vpop.xlane.xlu0 %707 }
 0x677   :  { %v1924_v59 = vpop.eup %1923  ;;  %v710_v62 = vmul.f32 0.032258064, %v708_v58 }
 0x678   :  { %v712_v45 = vmul.f32 %v1924_v59, %v709_v57 }
 0x679   :  { %1925 = vrsqrt.f32 %v710_v62  ;;  %vm730_vm12 = vcmp.eq.f32.partialorder %v710_v62, inf  ;;  %v733_v16 = vand.u32 2147483648, %v710_v62  ;;  %vm732_vm13 = vcmp.eq.f32.partialorder %v710_v62, 0.0 }
 0x67a   :  { %v713_v2 = vmul.f32 %v1924_v59, %v712_v45 }
 0x67c   :  { %v714_v46 = vmul.f32 0.5, %v713_v2 }
 0x67e   :  { %v715_v48 = vsub.f32 1.5, %v714_v46 }
 0x67f   :  { %v1926_v3 = vpop.eup %1925 }
 0x680   :  { %v716_v5 = vmul.f32 %v1924_v59, %v715_v48  ;;  %v724_v6 = vmul.f32 %v1926_v3, %v710_v62 }
 0x682   :  { %v717_v7 = vmul.f32 %v716_v5, %v709_v57  ;;  %v725_v8 = vmul.f32 %v1926_v3, %v724_v6 }
 0x684   :  { %v719_v4 = vsel %vm718_vm10, %v709_v57, %v717_v7  ;;  %v726_v11 = vmul.f32 0.5, %v725_v8  ;;  %v1805_v8 = vld [vmem:[#allocation2 + $0x58] sm:$0xff] }
 0x685   :  { %v722_v63 = vsel %vm720_vm11, %v721_v9, %v719_v4  ;;  %934 = vmatpush.bf16.msrb.mxu0 %v1805_v8  ;;  %v1804_v4 = vld [vmem:[#allocation2 + $0x50] sm:$0xff] }
 0x686   :  { %v727_v12 = vsub.f32 1.5, %v726_v11  ;;  %v735_v14 = vadd.f32 1e-06, %v722_v63 }
 0x688   :  { %v728_v13 = vmul.f32 %v1926_v3, %v727_v12  ;;  %1927 = vrcp.f32 %v735_v14 }
 0x689   :  { %935 = vmatpush.bf16.msrb.mxu0 %v1804_v4 }
 0x68a   :  { %v729_v15 = vmul.f32 %v728_v13, %v710_v62 }
 0x68c   :  { %v731_v17 = vsel %vm730_vm12, %v710_v62, %v729_v15 }
 0x68d   :  { %v734_v18 = vsel %vm732_vm13, %v733_v16, %v731_v17 }
 0x68e   :  { %v736_v19 = vadd.f32 1e-06, %v734_v18  ;;  %v1928_v21 = vpop.eup %1927 }
 0x68f   :  { %v742_v24 = vmul.f32 %v1928_v21, %v740_v22 }
 0x690   :  { %1929 = vrcp.f32 %v736_v19 }
 0x691   :  { %v745_v29 = vadd.f32 %v1868_v25, %v742_v24 }
 0x696   :  { %v1930_v26 = vpop.eup %1929 }
 0x697   :  { %v743_v27 = vmul.f32 %v1930_v26, %v741_v23 }
 0x699   :  { %v746_v30 = vadd.f32 %v1868_v25, %v743_v27 }
 0x69b   :  { %v747_v33 = vpack.c.bf16 %v746_v30, %v745_v29 }
 0x69d   :  { %1716 = vmatmul.msk.bf16.vlgmr.msra.gmra.mxu2 %vm73_vm0, %v747_v33 }
 0x720   :  { %v773_v39 = vpop.f32.mrf.mxu2 }
 0x721   :  { %v774_v41 = vadd.f32 %v1869_v42, %v773_v39  ;;  %v1871_v39 = vld [vmem:[%s2567_s3 + $0x8] ss:$0 sm:$0xff] }
 0x723   :  { %v778_v49 = vmax.f32 %v774_v41, 0.0 }
 0x728   :  { %v775_v0 = vpop.f32.mrf.mxu2 }
 0x729   :  { %v776_v47 = vadd.f32 %v1869_v42, %v775_v0 }
 0x72b   :  { %v779_v50 = vmax.f32 %v776_v47, 0.0 }
 0x72d   :  { %v780_v51 = vpack.c.bf16 %v779_v50, %v778_v49  ;;  %v1872_v49 = vld [vmem:[%s2567_s3 + $0x9] ss:$0 sm:$0xff] }
 0x72f   :  { %1733 = vmatmul.msk.bf16.vlgmr.msra.gmra.mxu3 %vm806_vm14, %v780_v51 }
 0x7b2   :  { %v819_v52 = vpop.f32.mrf.mxu3 }
 0x7b3   :  { %v820_v54 = vadd.f32 %v1870_v1, %v819_v52 }
 0x7b5   :  { %v2346_v55 = vadd.f32 %v820_v54, %v2316_v34 }
 0x7b7   :  { %v855_v56 = vsel %vm73_vm0, %v2346_v55, 0.0 }
 0x7b8   :  { %856 = vadd.xlane.f32.xlu0 %v855_v56  ;;  %v1873_v56 = vld [vmem:[%s2567_s3 + $0xf] ss:$0 sm:$0xff] }
 0x7ba   :  { %v821_v57 = vpop.f32.mrf.mxu3 }
 0x7bb   :  { %v822_v58 = vadd.f32 %v1870_v1, %v821_v57 }
 0x7bd   :  { %v2351_v59 = vadd.f32 %v822_v58, %v2321_v37 }
 0x7bf   :  { %v858_v62 = vsel %vm73_vm0, %v2351_v59, 0.0 }
 0x7c0   :  { %859 = vadd.xlane.f32.xlu0 %v858_v62 }
 0x82b   :  { %v857_v45 = vpop.xlane.xlu0 %856 }
 0x82c   :  { %v861_v2 = vmul.f32 %v857_v45, %v2102_v10 }
 0x82e   :  { %v863_v46 = vsub.f32 %v2346_v55, %v861_v2 }
 0x830   :  { %v865_v34 = vmul.f32 %v863_v46, %v863_v46  ;;  %v904_v41 = vmul.f32 %v1871_v39, %v863_v46 }
 0x832   :  { %v867_v48 = vsel %vm73_vm0, %v865_v34, 0.0 }
 0x833   :  { %868 = vadd.xlane.f32.xlu0 %v867_v48  ;;  %v860_v3 = vpop.xlane.xlu0 %859 }
 0x834   :  { %v862_v5 = vmul.f32 %v860_v3, %v2102_v10 }
 0x836   :  { %v864_v6 = vsub.f32 %v2351_v59, %v862_v5 }
 0x838   :  { %v866_v37 = vmul.f32 %v864_v6, %v864_v6  ;;  %v905_v0 = vmul.f32 %v1871_v39, %v864_v6 }
 0x83a   :  { %v870_v7 = vsel %vm73_vm0, %v866_v37, 0.0 }
 0x83b   :  { %871 = vadd.xlane.f32.xlu0 %v870_v7 }
 0x8a6   :  { %v869_v9 = vpop.xlane.xlu0 %868 }
 0x8a7   :  { %v873_v11 = vmul.f32 0.032258064, %v869_v9 }
 0x8a9   :  { %1931 = vrsqrt.f32 %v873_v11  ;;  %vm882_vm15 = vcmp.eq.f32.partialorder %v873_v11, inf  ;;  %v885_v23 = vand.u32 2147483648, %v873_v11  ;;  %vm884_vm1 = vcmp.eq.f32.partialorder %v873_v11, 0.0 }
 0x8ae   :  { %v872_v63 = vpop.xlane.xlu0 %871 }
 0x8af   :  { %v1932_v12 = vpop.eup %1931  ;;  %v874_v13 = vmul.f32 0.032258064, %v872_v63 }
 0x8b0   :  { %v876_v14 = vmul.f32 %v1932_v12, %v873_v11 }
 0x8b1   :  { %1933 = vrsqrt.f32 %v874_v13  ;;  %vm894_vm2 = vcmp.eq.f32.partialorder %v874_v13, inf  ;;  %v897_v35 = vand.u32 2147483648, %v874_v13  ;;  %vm896_vm3 = vcmp.eq.f32.partialorder %v874_v13, 0.0 }
 0x8b2   :  { %v877_v15 = vmul.f32 %v1932_v12, %v876_v14 }
 0x8b4   :  { %v878_v16 = vmul.f32 0.5, %v877_v15 }
 0x8b6   :  { %v879_v17 = vsub.f32 1.5, %v878_v16 }
 0x8b7   :  { %v1934_v18 = vpop.eup %1933 }
 0x8b8   :  { %v880_v19 = vmul.f32 %v1932_v12, %v879_v17  ;;  %v888_v20 = vmul.f32 %v1934_v18, %v874_v13 }
 0x8ba   :  { %v881_v21 = vmul.f32 %v880_v19, %v873_v11  ;;  %v889_v22 = vmul.f32 %v1934_v18, %v888_v20 }
 0x8bc   :  { %v883_v24 = vsel %vm882_vm15, %v873_v11, %v881_v21  ;;  %v890_v25 = vmul.f32 0.5, %v889_v22 }
 0x8bd   :  { %v886_v26 = vsel %vm884_vm1, %v885_v23, %v883_v24 }
 0x8be   :  { %v891_v27 = vsub.f32 1.5, %v890_v25  ;;  %v899_v30 = vadd.f32 1e-06, %v886_v26 }
 0x8c0   :  { %v892_v29 = vmul.f32 %v1934_v18, %v891_v27  ;;  %1935 = vrcp.f32 %v899_v30 }
 0x8c2   :  { %v893_v33 = vmul.f32 %v892_v29, %v874_v13 }
 0x8c4   :  { %v895_v32 = vsel %vm894_vm2, %v874_v13, %v893_v33 }
 0x8c5   :  { %v898_v36 = vsel %vm896_vm3, %v897_v35, %v895_v32 }
 0x8c6   :  { %v900_v38 = vadd.f32 1e-06, %v898_v36  ;;  %v1936_v42 = vpop.eup %1935 }
 0x8c7   :  { %v906_v47 = vmul.f32 %v1936_v42, %v904_v41 }
 0x8c8   :  { %1937 = vrcp.f32 %v900_v38 }
 0x8c9   :  { %v909_v1 = vadd.f32 %v1872_v49, %v906_v47 }
 0x8ce   :  { %v1938_v50 = vpop.eup %1937 }
 0x8cf   :  { %v907_v51 = vmul.f32 %v1938_v50, %v905_v0 }
 0x8d1   :  { %v910_v52 = vadd.f32 %v1872_v49, %v907_v51 }
 0x8d3   :  { %v911_v54 = vpack.c.bf16 %v910_v52, %v909_v1 }
 0x8d5   :  { %1742 = vmatmul.msk.bf16.vlgmr.msrb.gmra.mxu0 %vm73_vm0, %v911_v54 }
 0x952   :  { %v937_v57 = vpop.f32.mrf.mxu0 }
 0x953   :  { %v938_v58 = vadd.f32 %v1873_v56, %v937_v57 }
 0x955   :  { %v2371_v62 = vpack.c.bf16 %v938_v58, %v938_v58 }
 0x957   :  { %965 = vrot.lane.b32.xlu0 %v2371_v62, %s2044_s5  ;;  %990 = vrot.lane.b32.xlu2 %v2371_v62, %s2047_s8 }
 0x958   :  { %967 = vrot.lane.b32.xlu1 %v2371_v62, %s2045_s6 }
 0x95a   :  { %v939_v45 = vpop.f32.mrf.mxu0 }
 0x95b   :  { %v940_v2 = vadd.f32 %v1873_v56, %v939_v45 }
 0x95d   :  { %v2379_v46 = vpack.c.bf16 %v940_v2, %v940_v2 }
 0x95f   :  { %988 = vrot.lane.b32.xlu0 %v2371_v62, %s2043_s30  ;;  %1059 = vrot.lane.b32.xlu2 %v2379_v46, %s2045_s6 }
 0x960   :  { %1013 = vrot.lane.b32.xlu1 %v2371_v62, %s2049_s10 }
 0x967   :  { %1082 = vrot.lane.b32.xlu0 %v2379_v46, %s2047_s8  ;;  %1057 = vrot.lane.b32.xlu2 %v2379_v46, %s2044_s5 }
 0x968   :  { %1011 = vrot.lane.b32.xlu1 %v2371_v62, %s2046_s7 }
 0x96f   :  { %1080 = vrot.lane.b32.xlu0 %v2379_v46, %s2043_s30  ;;  %1103 = vrot.lane.b32.xlu2 %v2379_v46, %s2046_s7 }
 0x970   :  { %1105 = vrot.lane.b32.xlu1 %v2379_v46, %s2049_s10 }
 0x977   :  { %944 = vrot.lane.b32.xlu0 %v2371_v62, %s2048_s9 }
 0x978   :  { %1036 = vrot.lane.b32.xlu1 %v2379_v46, %s2048_s9 }
 0x9b1   :  { %v991_v34 = vpop.permute.xlu2 %990 }
 0x9b2   :  { %v996_v48 = vsel %vm172_vm6, %v991_v34, 0 }
 0x9b3   :  { %1005 = vmatpush.bf16.xpose.msrb.mxu3 %v996_v48 }
 0x9b9   :  { %v1060_v3 = vpop.permute.xlu2 %1059 }
 0x9ba   :  { %v1065_v7 = vsel %vm172_vm6, %v1060_v3, 0 }
 0x9c1   :  { %v1058_v13 = vpop.permute.xlu2 %1057 }
 0x9c9   :  { %v966_v5 = vpop.permute.xlu0 %965  ;;  %v1104_v18 = vpop.permute.xlu2 %1103 }
 0x9ca   :  { %v968_v6 = vpop.permute.xlu1 %967 }
 0x9cb   :  { %v973_v37 = vsel %vm172_vm6, %v968_v6, 0 }
 0x9cc   :  { %982 = vmatpush.bf16.xpose.msrb.mxu2 %v973_v37 }
 0x9d1   :  { %v989_v8 = vpop.permute.xlu0 %988 }
 0x9d2   :  { %v1014_v9 = vpop.permute.xlu1 %1013  ;;  %1745 = vmatmul.msk.bf16.vlgmr.msrb.gmra.mxu3 %vm172_vm6, %v989_v8 }
 0x9d3   :  { %v1019_v4 = vsel %vm172_vm6, %v1014_v9, 0  ;;  %1744 = vmatmul.msk.bf16.vlgmr.msrb.gmra.mxu2 %vm172_vm6, %v966_v5 }
 0x9d4   :  { %1074 = vmatpush.bf16.xpose.msra.mxu2 %v1065_v7  ;;  %1028 = vmatpush.bf16.xpose.msra.mxu0 %v1019_v4 }
 0x9d9   :  { %v1083_v11 = vpop.permute.xlu0 %1082 }
 0x9da   :  { %v1088_v63 = vsel %vm172_vm6, %v1083_v11, 0  ;;  %v1012_v12 = vpop.permute.xlu1 %1011 }
 0x9db   :  { %1746 = vmatmul.msk.bf16.vlgmr.msra.gmra.mxu0 %vm172_vm6, %v1012_v12  ;;  %1097 = vmatpush.bf16.xpose.msra.mxu3 %v1088_v63 }
 0x9e1   :  { %v1081_v14 = vpop.permute.xlu0 %1080 }
 0x9e2   :  { %v1106_v15 = vpop.permute.xlu1 %1105  ;;  %1749 = vmatmul.msk.bf16.vlgmr.msra.gmra.mxu3 %vm172_vm6, %v1081_v14 }
 0x9e3   :  { %v1111_v16 = vsel %vm172_vm6, %v1106_v15, 0  ;;  %1748 = vmatmul.msk.bf16.vlgmr.msra.gmra.mxu2 %vm172_vm6, %v1058_v13 }
 0x9e4   :  { %1120 = vmatpush.bf16.xpose.msrb.mxu0 %v1111_v16 }
 0x9e9   :  { %v945_v17 = vpop.permute.xlu0 %944 }
 0x9ea   :  { %v950_v19 = vsel %vm172_vm6, %v945_v17, 0  ;;  %v1037_v20 = vpop.permute.xlu1 %1036 }
 0x9eb   :  { %v1042_v21 = vsel %vm172_vm6, %v1037_v20, 0  ;;  %1750 = vmatmul.msk.bf16.vlgmr.msrb.gmra.mxu0 %vm172_vm6, %v1104_v18  ;;  %959 = vmatpush.bf16.xpose.msrb.mxu1 %v950_v19 }
 0x9f2   :  { %1743 = vmatmul.msk.bf16.vlgmr.msrb.gmra.mxu1 %vm172_vm6, %v2371_v62 }
 0x9f3   :  { %1051 = vmatpush.bf16.xpose.msra.mxu1 %v1042_v21 }
 0xa02   :  { %1747 = vmatmul.msk.bf16.vlgmr.msra.gmra.mxu1 %vm172_vm6, %v2379_v46 }
 0xa55   :  { %v1007_v22 = vpop.f32.mrf.mxu3 }
 0xa56   :  { %v984_v23 = vpop.f32.mrf.mxu2  ;;  %v1128_v24 = vadd.f32 %v1007_v22, %v2173_v28 }
 0xa57   :  { %v1127_v51 = vadd.f32 %v984_v23, %v2217_v53 }
 0xa58   :  { %v1030_v25 = vpop.f32.mrf.mxu0  ;;  %v1140_v26 = vsel %vm172_vm6, %v1128_v24, -inf }
 0xa59   :  { %v1129_v27 = vadd.f32 %v1030_v25, %v2178_v31  ;;  %1141 = vmax.xlane.f32.xlu0 %v1140_v26 }
 0xa5b   :  { %v1143_v29 = vsel %vm172_vm6, %v1129_v27, -inf }
 0xa5c   :  { %1144 = vmax.xlane.f32.xlu1 %v1143_v29 }
 0xa5d   :  { %v1009_v30 = vpop.f32.mrf.mxu3 }
 0xa5e   :  { %v986_v33 = vpop.f32.mrf.mxu2 }
 0xa60   :  { %v1032_v35 = vpop.f32.mrf.mxu0 }
 0xa65   :  { %v1099_v32 = vpop.f32.mrf.mxu3 }
 0xa66   :  { %v1076_v36 = vpop.f32.mrf.mxu2  ;;  %v2426_v38 = vadd.f32 %v1099_v32, %v2187_v40 }
 0xa67   :  { %v1131_v52 = vadd.f32 %v1076_v36, %v2224_v60 }
 0xa68   :  { %v1122_v39 = vpop.f32.mrf.mxu0  ;;  %v1152_v28 = vsel %vm172_vm6, %v2426_v38, -inf }
 0xa69   :  { %v1133_v42 = vadd.f32 %v1122_v39, %v2197_v44  ;;  %1153 = vmax.xlane.f32.xlu0 %v1152_v28  ;;  %v1137_v44 = vsel %vm172_vm6, %v1127_v51, -inf  ;;  %v1149_v57 = vsel %vm172_vm6, %v1131_v52, -inf }
 0xa6b   :  { %v1155_v31 = vsel %vm172_vm6, %v1133_v42, -inf }
 0xa6c   :  { %1156 = vmax.xlane.f32.xlu1 %v1155_v31 }
 0xa6d   :  { %v1101_v41 = vpop.f32.mrf.mxu3 }
 0xa6e   :  { %v1078_v0 = vpop.f32.mrf.mxu2 }
 0xa6f   :  { %v961_v47 = vpop.f32.mrf.mxu1 }
 0xa70   :  { %v2433_v49 = vadd.f32 %v961_v47, %v2192_v43  ;;  %v1124_v50 = vpop.f32.mrf.mxu0 }
 0xa72   :  { %v1134_v40 = vsel %vm172_vm6, %v2433_v49, -inf }
 0xa73   :  { %1135 = vmax.xlane.f32.xlu2 %v1134_v40 }
 0xa77   :  { %v963_v1 = vpop.f32.mrf.mxu1 }
 0xa7b   :  { %1138 = vmax.xlane.f32.xlu2 %v1137_v44 }
 0xa7f   :  { %v1053_v54 = vpop.f32.mrf.mxu1 }
 0xa80   :  { %v1130_v56 = vadd.f32 %v1053_v54, %v2229_v61 }
 0xa82   :  { %v1146_v43 = vsel %vm172_vm6, %v1130_v56, -inf }
 0xa83   :  { %1150 = vmax.xlane.f32.xlu2 %v1149_v57  ;;  %1147 = vmax.xlane.f32.xlu1 %v1146_v43 }
 0xa87   :  { %v1055_v58 = vpop.f32.mrf.mxu1 }
 0xa9c   :  { %1289 = vrot.lane.b32.xlu1 %v2371_v62, %s2050_s26 }
 0xacc   :  { %v1142_v53 = vpop.xlane.xlu0 %1141 }
 0xacd   :  { %v1160_v45 = vsub.f32 %v1128_v24, %v1142_v53 }
 0xacf   :  { %v1170_v2 = vmul.f32 1.442695, %v1160_v45  ;;  %v1145_v34 = vpop.xlane.xlu1 %1144 }
 0xad0   :  { %v1161_v48 = vsub.f32 %v1129_v27, %v1145_v34 }
 0xad1   :  { %1939 = vpow2.f32 %v1170_v2 }
 0xad2   :  { %v1172_v60 = vmul.f32 1.442695, %v1161_v48 }
 0xad4   :  { %1941 = vpow2.f32 %v1172_v60 }
 0xad7   :  { %v2445_v3 = vpop.eup %1939 }
 0xad8   :  { %v1188_v61 = vsel %vm172_vm6, %v2445_v3, 0.0 }
 0xad9   :  { %1189 = vadd.xlane.f32.xlu1 %v1188_v61 }
 0xada   :  { %v1942_v5 = vpop.eup %1941 }
 0xadb   :  { %v1191_v6 = vsel %vm172_vm6, %v1942_v5, 0.0 }
 0xadc   :  { %1192 = vadd.xlane.f32.xlu2 %v1191_v6  ;;  %v1154_v27 = vpop.xlane.xlu0 %1153 }
 0xadd   :  { %v1164_v30 = vsub.f32 %v2426_v38, %v1154_v27 }
 0xadf   :  { %v1157_v14 = vpop.xlane.xlu1 %1156  ;;  %v1178_v33 = vmul.f32 1.442695, %v1164_v30 }
 0xae0   :  { %v1165_v18 = vsub.f32 %v1133_v42, %v1157_v14 }
 0xae2   :  { %v1180_v20 = vmul.f32 1.442695, %v1165_v18 }
 0xae6   :  { %v1136_v37 = vpop.xlane.xlu2 %1135 }
 0xae7   :  { %v1158_v35 = vsub.f32 %v2433_v49, %v1136_v37 }
 0xae9   :  { %v1166_v32 = vmul.f32 1.442695, %v1158_v35 }
 0xaee   :  { %v1139_v7 = vpop.xlane.xlu2 %1138 }
 0xaef   :  { %v1159_v8 = vsub.f32 %v1127_v51, %v1139_v7 }
 0xaf1   :  { %v1168_v9 = vmul.f32 1.442695, %v1159_v8 }
 0xaf3   :  { %1943 = vpow2.f32 %v1168_v9 }
 0xaf4   :  { %1267 = vrot.lane.b32.xlu2 %v2371_v62, %s2052_s1 }
 0xaf6   :  { %v1151_v4 = vpop.xlane.xlu2 %1150  ;;  %v1148_v17 = vpop.xlane.xlu1 %1147 }
 0xaf7   :  { %v1163_v11 = vsub.f32 %v1131_v52, %v1151_v4  ;;  %v1162_v22 = vsub.f32 %v1130_v56, %v1148_v17 }
 0xaf9   :  { %v1944_v63 = vpop.eup %1943  ;;  %v1176_v12 = vmul.f32 1.442695, %v1163_v11  ;;  %v1174_v23 = vmul.f32 1.442695, %v1162_v22 }
 0xafa   :  { %v1185_v13 = vsel %vm172_vm6, %v1944_v63, 0.0 }
 0xafb   :  { %1945 = vpow2.f32 %v1176_v12  ;;  %1186 = vadd.xlane.f32.xlu0 %v1185_v13 }
 0xafc   :  { %1947 = vpow2.f32 %v1180_v20 }
 0xafd   :  { %1949 = vpow2.f32 %v1174_v23 }
 0xafe   :  { %1951 = vpow2.f32 %v1178_v33 }
 0xaff   :  { %1953 = vpow2.f32 %v1166_v32 }
 0xb01   :  { %v2453_v15 = vpop.eup %1945 }
 0xb02   :  { %v1197_v16 = vsel %vm172_vm6, %v2453_v15, 0.0  ;;  %v2460_v24 = vpop.eup %1947 }
 0xb03   :  { %1198 = vadd.xlane.f32.xlu1 %v1197_v16  ;;  %v1203_v25 = vsel %vm172_vm6, %v2460_v24, 0.0  ;;  %v2466_v26 = vpop.eup %1949 }
 0xb04   :  { %v1194_v29 = vsel %vm172_vm6, %v2466_v26, 0.0  ;;  %v1952_v36 = vpop.eup %1951 }
 0xb05   :  { %v1200_v39 = vsel %vm172_vm6, %v1952_v36, 0.0  ;;  %v1954_v28 = vpop.eup %1953 }
 0xb06   :  { %v1182_v42 = vsel %vm172_vm6, %v1954_v28, 0.0 }
 0xb0e   :  { %v1290_v19 = vpop.permute.xlu1 %1289 }
 0xb0f   :  { %v1295_v21 = vsel %vm455_vm7, %v1290_v19, 0  ;;  %1245 = vrot.lane.b32.xlu0 %v2371_v62, %s2051_s27 }
 0xb10   :  { %1304 = vmatpush.bf16.msra.mxu0 %v1295_v21 }
 0xb1c   :  { %1348 = vrot.lane.b32.xlu1 %v2379_v46, %s2051_s27 }
 0xb1d   :  { %1204 = vadd.xlane.f32.xlu2 %v1203_v25 }
 0xb24   :  { %1370 = vrot.lane.b32.xlu1 %v2379_v46, %s2052_s1 }
 0xb25   :  { %1195 = vadd.xlane.f32.xlu2 %v1194_v29 }
 0xb2c   :  { %1392 = vrot.lane.b32.xlu1 %v2379_v46, %s2050_s26 }
 0xb34   :  { %1223 = vrot.lane.b32.xlu1 %v2371_v62, %s2040_s20 }
 0xb39   :  { %1201 = vadd.xlane.f32.xlu0 %v1200_v39 }
 0xb41   :  { %1183 = vadd.xlane.f32.xlu0 %v1182_v42 }
 0xb4c   :  { %v1190_v38 = vpop.xlane.xlu1 %1189 }
 0xb4d   :  { %1955 = vrcp.f32 %v1190_v38 }
 0xb4f   :  { %v1193_v31 = vpop.xlane.xlu2 %1192 }
 0xb50   :  { %1957 = vrcp.f32 %v1193_v31 }
 0xb53   :  { %v1956_v41 = vpop.eup %1955 }
 0xb54   :  { %v1216_v62 = vmul.f32 %v1956_v41, %v2445_v3 }
 0xb55   :  { %1326 = vrot.lane.b32.xlu0 %v2379_v46, %s2040_s20 }
 0xb56   :  { %v1958_v0 = vpop.eup %1957  ;;  %v1266_v51 = vpack.c.bf16 %v1216_v62, %v1216_v62  ;;  %v1807_v62 = vld [vmem:[#allocation2 + $0x68] sm:$0xff] }
 0xb57   :  { %v1217_v47 = vmul.f32 %v1958_v0, %v1942_v5  ;;  %v1268_v49 = vpop.permute.xlu2 %1267 }
 0xb58   :  { %v1273_v50 = vsel %vm455_vm7, %v1268_v49, 0 }
 0xb59   :  { %v1288_v40 = vpack.c.bf16 %v1217_v47, %v1217_v47  ;;  %1282 = vmatpush.bf16.msrb.mxu3 %v1273_v50  ;;  %v1806_v47 = vld [vmem:[#allocation2 + $0x60] sm:$0xff] }
 0xb5b   :  { %1754 = vmatmul.msk.bf16.vlgmr.msra.gmra.mxu0 %vm172_vm6, %v1288_v40 }
 0xb5c   :  { %1753 = vmatmul.msk.bf16.vlgmr.msrb.gmra.mxu3 %vm172_vm6, %v1266_v51 }
 0xb6e   :  { %v1187_v1 = vpop.xlane.xlu0 %1186 }
 0xb6f   :  { %1959 = vrcp.f32 %v1187_v1 }
 0xb75   :  { %v1960_v44 = vpop.eup %1959 }
 0xb76   :  { %v1215_v52 = vmul.f32 %v1960_v44, %v1944_v63  ;;  %v1199_v57 = vpop.xlane.xlu1 %1198 }
 0xb77   :  { %1961 = vrcp.f32 %v1199_v57 }
 0xb78   :  { %v1244_v56 = vpack.c.bf16 %v1215_v52, %v1215_v52 }
 0xb7d   :  { %v1962_v43 = vpop.eup %1961 }
 0xb7e   :  { %v1219_v45 = vmul.f32 %v1962_v43, %v2453_v15 }
 0xb80   :  { %v1347_v34 = vpack.c.bf16 %v1219_v45, %v1219_v45 }
 0xb81   :  { %v1246_v54 = vpop.permute.xlu0 %1245 }
 0xb82   :  { %v1251_v46 = vsel %vm455_vm7, %v1246_v54, 0 }
 0xb83   :  { %1260 = vmatpush.bf16.msrb.mxu2 %v1251_v46 }
 0xb86   :  { %1752 = vmatmul.msk.bf16.vlgmr.msrb.gmra.mxu2 %vm172_vm6, %v1244_v56 }
 0xb8e   :  { %v1349_v58 = vpop.permute.xlu1 %1348 }
 0xb8f   :  { %v1354_v53 = vsel %vm455_vm7, %v1349_v58, 0 }
 0xb90   :  { %1363 = vmatpush.bf16.msra.mxu2 %v1354_v53  ;;  %v1205_v2 = vpop.xlane.xlu2 %1204 }
 0xb91   :  { %1963 = vrcp.f32 %v1205_v2 }
 0xb96   :  { %1756 = vmatmul.msk.bf16.vlgmr.msra.gmra.mxu2 %vm172_vm6, %v1347_v34  ;;  %v1371_v48 = vpop.permute.xlu1 %1370  ;;  %v1874_v34 = vld [vmem:[%s2567_s3 + $0xc] ss:$0 sm:$0xff] }
 0xb97   :  { %v1376_v60 = vsel %vm455_vm7, %v1371_v48, 0  ;;  %v1964_v3 = vpop.eup %1963 }
 0xb98   :  { %1385 = vmatpush.bf16.msra.mxu3 %v1376_v60  ;;  %v1221_v61 = vmul.f32 %v1964_v3, %v2460_v24  ;;  %v1196_v15 = vpop.xlane.xlu2 %1195 }
 0xb9a   :  { %v1391_v37 = vpack.c.bf16 %v1221_v61, %v1221_v61 }
 0xb9e   :  { %v1393_v5 = vpop.permute.xlu1 %1392 }
 0xb9f   :  { %v1398_v6 = vsel %vm455_vm7, %v1393_v5, 0 }
 0xba0   :  { %1407 = vmatpush.bf16.msrb.mxu0 %v1398_v6 }
 0xba3   :  { %1758 = vmatmul.msk.bf16.vlgmr.msrb.gmra.mxu0 %vm172_vm6, %v1391_v37 }
 0xba6   :  { %v1224_v7 = vpop.permute.xlu1 %1223 }
 0xba7   :  { %v1229_v8 = vsel %vm455_vm7, %v1224_v7, 0 }
 0xba8   :  { %1238 = vmatpush.bf16.msrb.mxu1 %v1229_v8 }
 0xbac   :  { %v1202_v9 = vpop.xlane.xlu0 %1201 }
 0xbad   :  { %1965 = vrcp.f32 %v1202_v9 }
 0xbb3   :  { %v1966_v4 = vpop.eup %1965 }
 0xbb4   :  { %v1220_v11 = vmul.f32 %v1966_v4, %v1952_v36  ;;  %v1184_v63 = vpop.xlane.xlu0 %1183 }
 0xbb5   :  { %1967 = vrcp.f32 %v1184_v63 }
 0xbb6   :  { %v1369_v12 = vpack.c.bf16 %v1220_v11, %v1220_v11  ;;  %1969 = vrcp.f32 %v1196_v15  ;;  %v1809_v15 = vld [vmem:[#allocation2 + $0x78] sm:$0xff] }
 0xbb7   :  { %1540 = vmatpush.bf16.msrb.mxu2 %v1809_v15 }
 0xbb8   :  { %1757 = vmatmul.msk.bf16.vlgmr.msra.gmra.mxu3 %vm172_vm6, %v1369_v12 }
 0xbbb   :  { %v1968_v13 = vpop.eup %1967 }
 0xbbc   :  { %v1214_v14 = vmul.f32 %v1968_v13, %v1954_v28  ;;  %v1970_v17 = vpop.eup %1969 }
 0xbbd   :  { %v1218_v20 = vmul.f32 %v1970_v17, %v2466_v26  ;;  %v1808_v17 = vld [vmem:[#allocation2 + $0x70] sm:$0xff] }
 0xbbe   :  { %v1222_v16 = vpack.c.bf16 %v1214_v14, %v1214_v14  ;;  %1541 = vmatpush.bf16.msrb.mxu2 %v1808_v17 }
 0xbbf   :  { %v1325_v21 = vpack.c.bf16 %v1218_v20, %v1218_v20 }
 0xbc0   :  { %1751 = vmatmul.msk.bf16.vlgmr.msrb.gmra.mxu1 %vm172_vm6, %v1222_v16 }
 0xbc7   :  { %v1327_v18 = vpop.permute.xlu0 %1326 }
 0xbc8   :  { %v1332_v19 = vsel %vm455_vm7, %v1327_v18, 0 }
 0xbc9   :  { %1341 = vmatpush.bf16.msra.mxu1 %v1332_v19 }
 0xbcd   :  { %1451 = vmatpush.bf16.msrb.mxu1 %v1807_v62 }
 0xbd0   :  { %1755 = vmatmul.msk.bf16.vlgmr.msra.gmra.mxu1 %vm172_vm6, %v1325_v21 }
 0xbd1   :  { %1452 = vmatpush.bf16.msrb.mxu1 %v1806_v47 }
 0xbd8   :  { %v1306_v22 = vpop.f32.mrf.mxu0 }
 0xbdf   :  { %v1284_v23 = vpop.f32.mrf.mxu3 }
 0xbe0   :  { %v1308_v24 = vpop.f32.mrf.mxu0 }
 0xbe7   :  { %v1286_v25 = vpop.f32.mrf.mxu3 }
 0xc09   :  { %v1262_v27 = vpop.f32.mrf.mxu2 }
 0xc11   :  { %v1264_v29 = vpop.f32.mrf.mxu2 }
 0xc19   :  { %v1365_v30 = vpop.f32.mrf.mxu2 }
 0xc1a   :  { %v1848_v33 = vpack.i.bf16 %v1365_v30, %v1262_v27 }
 0xc1c   :  { %1849 = vrot.lane.b32.xlu1 %v1848_v33, %s2053_s28 }
 0xc20   :  { %v1409_v35 = vpop.f32.mrf.mxu0 }
 0xc21   :  { %v1858_v32 = vpack.i.bf16 %v1409_v35, %v1306_v22  ;;  %v1367_v36 = vpop.f32.mrf.mxu2 }
 0xc24   :  { %1859 = vrot.lane.b32.xlu1 %v1858_v32, %s2054_s29 }
 0xc28   :  { %v1411_v39 = vpop.f32.mrf.mxu0 }
 0xc3b   :  { %v1387_v26 = vpop.f32.mrf.mxu3 }
 0xc3c   :  { %v1853_v28 = vpack.i.bf16 %v1387_v26, %v1284_v23 }
 0xc3d   :  { %v1240_v42 = vpop.f32.mrf.mxu1 }
 0xc3e   :  { %1854 = vrot.lane.b32.xlu2 %v1853_v28, %s2055_s11 }
 0xc43   :  { %v1389_v38 = vpop.f32.mrf.mxu3 }
 0xc45   :  { %v1242_v31 = vpop.f32.mrf.mxu1 }
 0xc4d   :  { %v1343_v41 = vpop.f32.mrf.mxu1 }
 0xc55   :  { %v1345_v0 = vpop.f32.mrf.mxu1 }
 0xc8e   :  { %v1850_v49 = vpop.permute.xlu1 %1849 }
 0xc8f   :  { %v1852_v50 = vunpack.i.h.bf16 %v1850_v49  ;;  %v1851_v40 = vunpack.i.l.bf16 %v1850_v49  ;;  %v1875_v49 = vld [vmem:[%s2567_s3 + $0xa] ss:$0 sm:$0xff] }
 0xc91   :  { %v1425_v54 = vsel %vm172_vm6, %v1343_v41, %v1852_v50  ;;  %v1322_v46 = vsel %vm172_vm6, %v1240_v42, %v1851_v40 }
 0xc96   :  { %v1860_v51 = vpop.permute.xlu1 %1859 }
 0xc97   :  { %v1862_v56 = vunpack.i.h.bf16 %v1860_v51  ;;  %v1861_v57 = vunpack.i.l.bf16 %v1860_v51 }
 0xc98   :  { %v1855_v1 = vpop.permute.xlu2 %1854 }
 0xc99   :  { %v1857_v44 = vunpack.i.h.bf16 %v1855_v1  ;;  %v1856_v52 = vunpack.i.l.bf16 %v1855_v1 }
 0xc9b   :  { %v1323_v43 = vsel %vm551_vm8, %v1322_v46, %v1856_v52  ;;  %v1426_v58 = vsel %vm551_vm8, %v1425_v54, %v1857_v44  ;;  %v1876_v44 = vld [vmem:[%s2567_s3 + $0xb] ss:$0 sm:$0xff] }
 0xc9c   :  { %v1324_v53 = vsel %vm553_vm9, %v1323_v43, %v1861_v57  ;;  %v1427_v45 = vsel %vm553_vm9, %v1426_v58, %v1862_v56  ;;  %v1813_v43 = vld [vmem:[#allocation2 + $0x98] sm:$0xff]  ;;  %v1812_v58 = vld [vmem:[#allocation2 + $0x90] sm:$0xff] }
 0xc9d   :  { %v1428_v2 = vpack.c.bf16 %v1427_v45, %v1324_v53  ;;  %1583 = vmatpush.bf16.msrb.mxu3 %v1813_v43  ;;  %v1811_v53 = vld [vmem:[#allocation2 + $0x88] sm:$0xff]  ;;  %v1810_v45 = vld [vmem:[#allocation2 + $0x80] sm:$0xff] }
 0xc9f   :  { %1767 = vmatmul.msk.bf16.vlgmr.msrb.gmra.mxu1 %vm73_vm0, %v1428_v2 }
 0xca1   :  { %1584 = vmatpush.bf16.msrb.mxu3 %v1812_v58 }
 0xca5   :  { %1585 = vmatpush.bf16.msrb.mxu3 %v1811_v53 }
 0xca9   :  { %1586 = vmatpush.bf16.msrb.mxu3 %v1810_v45 }
 0xd1c   :  { %v1454_v48 = vpop.f32.mrf.mxu1 }
 0xd1d   :  { %v1455_v60 = vadd.f32 %v1874_v34, %v1454_v48 }
 0xd1f   :  { %v2515_v3 = vadd.f32 %v1455_v60, %v2346_v55 }
 0xd21   :  { %v1461_v61 = vsel %vm73_vm0, %v2515_v3, 0.0 }
 0xd22   :  { %1462 = vadd.xlane.f32.xlu0 %v1461_v61 }
 0xd24   :  { %v1456_v5 = vpop.f32.mrf.mxu1 }
 0xd25   :  { %v1457_v6 = vadd.f32 %v1874_v34, %v1456_v5  ;;  %v1877_v34 = vld [vmem:[%s2567_s3 + $0xe] ss:$0 sm:$0xff] }
 0xd27   :  { %v2520_v37 = vadd.f32 %v1457_v6, %v2351_v59 }
 0xd29   :  { %v1464_v7 = vsel %vm73_vm0, %v2520_v37, 0.0 }
 0xd2a   :  { %1465 = vadd.xlane.f32.xlu1 %v1464_v7 }
 0xd95   :  { %v1463_v8 = vpop.xlane.xlu0 %1462 }
 0xd96   :  { %v1467_v9 = vmul.f32 %v1463_v8, %v2102_v10  ;;  %v1878_v8 = vld [vmem:[%s2567_s3 + $0xd] ss:$0 sm:$0xff] }
 0xd98   :  { %v1469_v4 = vsub.f32 %v2515_v3, %v1467_v9 }
 0xd9a   :  { %v1471_v55 = vmul.f32 %v1469_v4, %v1469_v4  ;;  %v1510_v40 = vmul.f32 %v1875_v49, %v1469_v4 }
 0xd9c   :  { %v1473_v11 = vsel %vm73_vm0, %v1471_v55, 0.0 }
 0xd9d   :  { %v1466_v63 = vpop.xlane.xlu1 %1465  ;;  %1474 = vadd.xlane.f32.xlu2 %v1473_v11 }
 0xd9e   :  { %v1468_v12 = vmul.f32 %v1466_v63, %v2102_v10 }
 0xda0   :  { %v1470_v13 = vsub.f32 %v2520_v37, %v1468_v12 }
 0xda2   :  { %v1472_v59 = vmul.f32 %v1470_v13, %v1470_v13  ;;  %v1511_v51 = vmul.f32 %v1875_v49, %v1470_v13 }
 0xda4   :  { %v1476_v14 = vsel %vm73_vm0, %v1472_v59, 0.0 }
 0xda5   :  { %1477 = vadd.xlane.f32.xlu0 %v1476_v14 }
 0xe10   :  { %v1475_v16 = vpop.xlane.xlu2 %1474 }
 0xe11   :  { %v1479_v18 = vmul.f32 0.032258064, %v1475_v16 }
 0xe13   :  { %1971 = vrsqrt.f32 %v1479_v18  ;;  %vm1488_vm4 = vcmp.eq.f32.partialorder %v1479_v18, inf  ;;  %v1491_v32 = vand.u32 2147483648, %v1479_v18  ;;  %vm1490_vm5 = vcmp.eq.f32.partialorder %v1479_v18, 0.0 }
 0xe18   :  { %v1478_v19 = vpop.xlane.xlu0 %1477 }
 0xe19   :  { %v1972_v20 = vpop.eup %1971  ;;  %v1480_v21 = vmul.f32 0.032258064, %v1478_v19 }
 0xe1a   :  { %v1482_v22 = vmul.f32 %v1972_v20, %v1479_v18 }
 0xe1b   :  { %1973 = vrsqrt.f32 %v1480_v21  ;;  %vm1500_vm6 = vcmp.eq.f32.partialorder %v1480_v21, inf  ;;  %v1503_v41 = vand.u32 2147483648, %v1480_v21  ;;  %vm1502_vm7 = vcmp.eq.f32.partialorder %v1480_v21, 0.0 }
 0xe1c   :  { %v1483_v23 = vmul.f32 %v1972_v20, %v1482_v22 }
 0xe1e   :  { %v1484_v24 = vmul.f32 0.5, %v1483_v23 }
 0xe20   :  { %v1485_v25 = vsub.f32 1.5, %v1484_v24 }
 0xe21   :  { %v1974_v27 = vpop.eup %1973 }
 0xe22   :  { %v1486_v29 = vmul.f32 %v1972_v20, %v1485_v25  ;;  %v1494_v30 = vmul.f32 %v1974_v27, %v1480_v21 }
 0xe24   :  { %v1487_v33 = vmul.f32 %v1486_v29, %v1479_v18  ;;  %v1495_v35 = vmul.f32 %v1974_v27, %v1494_v30 }
 0xe26   :  { %v1489_v36 = vsel %vm1488_vm4, %v1479_v18, %v1487_v33  ;;  %v1496_v39 = vmul.f32 0.5, %v1495_v35 }
 0xe27   :  { %v1492_v26 = vsel %vm1490_vm5, %v1491_v32, %v1489_v36 }
 0xe28   :  { %v1497_v28 = vsub.f32 1.5, %v1496_v39  ;;  %v1505_v38 = vadd.f32 1e-06, %v1492_v26 }
 0xe2a   :  { %v1498_v42 = vmul.f32 %v1974_v27, %v1497_v28  ;;  %1975 = vrcp.f32 %v1505_v38 }
 0xe2c   :  { %v1499_v31 = vmul.f32 %v1498_v42, %v1480_v21 }
 0xe2e   :  { %v1501_v0 = vsel %vm1500_vm6, %v1480_v21, %v1499_v31 }
 0xe2f   :  { %v1504_v62 = vsel %vm1502_vm7, %v1503_v41, %v1501_v0 }
 0xe30   :  { %v1506_v47 = vadd.f32 1e-06, %v1504_v62  ;;  %v1976_v50 = vpop.eup %1975 }
 0xe31   :  { %v1512_v1 = vmul.f32 %v1976_v50, %v1510_v40 }
 0xe32   :  { %1977 = vrcp.f32 %v1506_v47  ;;  %v1879_v47 = vld [vmem:[%s2567_s3 + $0x10] ss:$0 sm:$0xff] }
 0xe33   :  { %v1515_v46 = vadd.f32 %v1876_v44, %v1512_v1 }
 0xe38   :  { %v1978_v52 = vpop.eup %1977 }
 0xe39   :  { %v1513_v54 = vmul.f32 %v1978_v52, %v1511_v51 }
 0xe3b   :  { %v1516_v56 = vadd.f32 %v1876_v44, %v1513_v54  ;;  %v1880_v44 = vld [vmem:[%s2567_s3 + $0x11] ss:$0 sm:$0xff]  ;;  %s2057_s3 = smov 128  }
 0xe3d   :  { %v1517_v57 = vpack.c.bf16 %v1516_v56, %v1515_v46 }
 0xe3f   :  { %1776 = vmatmul.msk.bf16.vlgmr.msrb.gmra.mxu2 %vm73_vm0, %v1517_v57 }
 0xec2   :  { %v1543_v2 = vpop.f32.mrf.mxu2 }
 0xec3   :  { %v1544_v48 = vadd.f32 %v1877_v34, %v1543_v2 }
 0xec5   :  { %v1548_v5 = vmax.f32 %v1544_v48, 0.0 }
 0xeca   :  { %v1545_v60 = vpop.f32.mrf.mxu2 }
 0xecb   :  { %v1546_v61 = vadd.f32 %v1877_v34, %v1545_v60 }
 0xecd   :  { %v1549_v6 = vmax.f32 %v1546_v61, 0.0 }
 0xecf   :  { %v1550_v7 = vpack.c.bf16 %v1549_v6, %v1548_v5 }
 0xed1   :  { %1793 = vmatmul.msk.bf16.vlgmr.msrb.gmra.mxu3 %vm806_vm14, %v1550_v7 }
 0xf54   :  { %v1588_v9 = vpop.f32.mrf.mxu3 }
 0xf55   :  { %v1589_v4 = vadd.f32 %v1878_v8, %v1588_v9 }
 0xf57   :  { %v1593_v55 = vadd.f32 %v1589_v4, %v2515_v3 }
 0xf59   :  { %v1597_v11 = vsel %vm73_vm0, %v1593_v55, 0.0 }
 0xf5a   :  { %1598 = vadd.xlane.f32.xlu1 %v1597_v11 }
 0xf5c   :  { %v1590_v63 = vpop.f32.mrf.mxu3 }
 0xf5d   :  { %v1591_v12 = vadd.f32 %v1878_v8, %v1590_v63 }
 0xf5f   :  { %v1594_v13 = vadd.f32 %v1591_v12, %v2520_v37 }
 0xf61   :  { %v1600_v59 = vsel %vm73_vm0, %v1594_v13, 0.0 }
 0xf62   :  { %1601 = vadd.xlane.f32.xlu0 %v1600_v59 }
 0xfcd   :  { %v1599_v14 = vpop.xlane.xlu1 %1598 }
 0xfce   :  { %v1603_v15 = vmul.f32 %v1599_v14, %v2102_v10 }
 0xfd0   :  { %v1605_v16 = vsub.f32 %v1593_v55, %v1603_v15 }
 0xfd2   :  { %v1607_v17 = vmul.f32 %v1605_v16, %v1605_v16  ;;  %v1646_v51 = vmul.f32 %v1879_v47, %v1605_v16 }
 0xfd4   :  { %v1609_v18 = vsel %vm73_vm0, %v1607_v17, 0.0 }
 0xfd5   :  { %v1602_v19 = vpop.xlane.xlu0 %1601  ;;  %1610 = vadd.xlane.f32.xlu2 %v1609_v18 }
 0xfd6   :  { %v1604_v3 = vmul.f32 %v1602_v19, %v2102_v10 }
 0xfd8   :  { %v1606_v20 = vsub.f32 %v1594_v13, %v1604_v3 }
 0xfda   :  { %v1608_v21 = vmul.f32 %v1606_v20, %v1606_v20  ;;  %v1647_v57 = vmul.f32 %v1879_v47, %v1606_v20 }
 0xfdc   :  { %v1612_v22 = vsel %vm73_vm0, %v1608_v21, 0.0 }
 0xfdd   :  { %1613 = vadd.xlane.f32.xlu1 %v1612_v22 }
0x1048   :  { %v1611_v37 = vpop.xlane.xlu2 %1610 }
0x1049   :  { %v1615_v23 = vmul.f32 0.032258064, %v1611_v37 }
0x104b   :  { %1979 = vrsqrt.f32 %v1615_v23  ;;  %vm1624_vm8 = vcmp.eq.f32.partialorder %v1615_v23, inf  ;;  %v1627_v28 = vand.u32 2147483648, %v1615_v23  ;;  %vm1626_vm9 = vcmp.eq.f32.partialorder %v1615_v23, 0.0 }
0x1050   :  { %v1614_v24 = vpop.xlane.xlu1 %1613 }
0x1051   :  { %v1980_v25 = vpop.eup %1979  ;;  %v1616_v27 = vmul.f32 0.032258064, %v1614_v24 }
0x1052   :  { %v1618_v29 = vmul.f32 %v1980_v25, %v1615_v23 }
0x1053   :  { %1981 = vrsqrt.f32 %v1616_v27  ;;  %vm1636_vm10 = vcmp.eq.f32.partialorder %v1616_v27, inf  ;;  %v1639_v50 = vand.u32 2147483648, %v1616_v27  ;;  %vm1638_vm11 = vcmp.eq.f32.partialorder %v1616_v27, 0.0 }
0x1054   :  { %v1619_v30 = vmul.f32 %v1980_v25, %v1618_v29 }
0x1056   :  { %v1620_v33 = vmul.f32 0.5, %v1619_v30 }
0x1058   :  { %v1621_v35 = vsub.f32 1.5, %v1620_v33 }
0x1059   :  { %v1982_v32 = vpop.eup %1981 }
0x105a   :  { %v1622_v36 = vmul.f32 %v1980_v25, %v1621_v35  ;;  %v1630_v39 = vmul.f32 %v1982_v32, %v1616_v27 }
0x105c   :  { %v1623_v10 = vmul.f32 %v1622_v36, %v1615_v23  ;;  %v1631_v26 = vmul.f32 %v1982_v32, %v1630_v39 }
0x105e   :  { %v1625_v42 = vsel %vm1624_vm8, %v1615_v23, %v1623_v10  ;;  %v1632_v38 = vmul.f32 0.5, %v1631_v26 }
0x105f   :  { %v1628_v31 = vsel %vm1626_vm9, %v1627_v28, %v1625_v42 }
0x1060   :  { %v1633_v41 = vsub.f32 1.5, %v1632_v38  ;;  %v1641_v0 = vadd.f32 1e-06, %v1628_v31 }
0x1062   :  { %v1634_v62 = vmul.f32 %v1982_v32, %v1633_v41  ;;  %1983 = vrcp.f32 %v1641_v0 }
0x1064   :  { %v1635_v49 = vmul.f32 %v1634_v62, %v1616_v27 }
0x1066   :  { %v1637_v40 = vsel %vm1636_vm10, %v1616_v27, %v1635_v49 }
0x1067   :  { %v1640_v1 = vsel %vm1638_vm11, %v1639_v50, %v1637_v40 }
0x1068   :  { %v1984_v52 = vpop.eup %1983  ;;  %v1642_v54 = vadd.f32 1e-06, %v1640_v1 }
0x1069   :  { %v1648_v46 = vmul.f32 %v1984_v52, %v1646_v51 }
0x106a   :  { %1985 = vrcp.f32 %v1642_v54 }
0x106b   :  { %v1651_v56 = vadd.f32 %v1880_v44, %v1648_v46 }
0x106d   :  { %1653 = vst.msk [vmem:[#allocation5] sm:$0xff] %vm73_vm0, %v1651_v56 }
0x1070   :  { %v1986_v43 = vpop.eup %1985 }
0x1071   :  { %v1649_v58 = vmul.f32 %v1986_v43, %v1647_v57 }
0x1073   :  { %v1652_v53 = vadd.f32 %v1880_v44, %v1649_v58 }
0x1075   :  { %1654 = vst.msk [vmem:[#allocation5 + $0x8] sm:$0xff] %vm73_vm0, %v1652_v53 }
0x1076   :  { %1667 = dma.vmem_to_hbm [thread:$0]  %s1660_s15, 256, %s1662_s18, [#allocation4], %s2057_s3, %s2057_s3, %s2053_s28  }
0x1077   :  { %2037 = dma.done.wait [#allocation4], 256  }
0x1078   :  { %2038 = vsyncadd [#allocation4], 4294967040 }
0x1079   :  { %1672 = vsyncpa [#allocation3], 1 }
0x107a   :  { %1673 = vsyncpa [#allocation4], 1 }

</bundles_post_ra>
